<compile_context>
chip_gen: v5e
topology: v5e:2x2
jax: 0.10.0
libtpu: 0.0.40
codegen_flags: <defaults>
</compile_context>

<pallas_src>
import functools
import math

import jax
import jax.numpy as jnp
from jax import lax
from jax.experimental import pallas as pl
from jax.experimental.pallas import tpu as pltpu

BN_EPS = 1e-5
LN_EPS = 1e-5


def _round_up(x, m):
    return (x + m - 1) // m * m


def _pick_tile(dim, align, candidates=(512, 384, 256, 128)):
    """Pick (tile, padded_dim): largest candidate whose zero-pad waste <= dim/8."""
    if dim <= candidates[-1]:
        t = _round_up(dim, align)
        return t, t
    for c in candidates:
        if c % align:
            continue
        p = _round_up(dim, c)
        if p - dim <= dim // 8:
            return c, p
    c = candidates[-1]
    return c, _round_up(dim, c)


# ----------------------------------------------------------------------------
# Pallas kernels
# ----------------------------------------------------------------------------
def _mm_kernel(x_ref, w_ref, s_ref, b_ref, o_ref, *, relu):
    """o = relu?((x @ w) * s + b); accumulate directly into the resident out block."""
    k = pl.program_id(2)

    @pl.when(k == 0)
    def _():
        o_ref[...] = jnp.zeros_like(o_ref)

    o_ref[...] += jnp.dot(x_ref[...], w_ref[...],
                          preferred_element_type=jnp.float32)

    @pl.when(k == pl.num_programs(2) - 1)
    def _():
        y = o_ref[...] * s_ref[...] + b_ref[...]
        if relu:
            y = jnp.maximum(y, 0.0)
        o_ref[...] = y


def _mm_res_kernel(x_ref, w_ref, s_ref, b_ref, r_ref, o_ref, *, relu):
    """o = relu?((x @ w) * s + b + residual); residual fused in the epilogue."""
    k = pl.program_id(2)

    @pl.when(k == 0)
    def _():
        o_ref[...] = jnp.zeros_like(o_ref)

    o_ref[...] += jnp.dot(x_ref[...], w_ref[...],
                          preferred_element_type=jnp.float32)

    @pl.when(k == pl.num_programs(2) - 1)
    def _():
        y = o_ref[...] * s_ref[...] + b_ref[...] + r_ref[...]
        if relu:
            y = jnp.maximum(y, 0.0)
        o_ref[...] = y


def pallas_matmul_affine(x, w, scale=None, bias=None, relu=False, residual=None):
    """y[:M,:N] = relu?((x @ w) * scale + bias (+ residual)).

    x:(M,K)  w:(K,N)  scale/bias:(N,)  residual:(M,N).
    bf16 MXU operands, f32 accumulation, 3-D tiling (M,N parallel; K arbitrary).
    """
    M, K = x.shape
    K2, N = w.shape
    assert K == K2
    if scale is None:
        scale = jnp.ones((N,), jnp.float32)
    if bias is None:
        bias = jnp.zeros((N,), jnp.float32)

    # bf16 operands => sublane min-tile of 16 on the M axis; 128 on lane axes.
    TM, Mp = _pick_tile(M, 16)
    TN, Np = _pick_tile(N, 128)
    TK, Kp = _pick_tile(K, 128)

    xb = x.astype(jnp.bfloat16)
    if (Mp, Kp) != (M, K):
        xb = jnp.pad(xb, ((0, Mp - M), (0, Kp - K)))
    wb = w.astype(jnp.bfloat16)
    if (Kp, Np) != (K, N):
        wb = jnp.pad(wb, ((0, Kp - K), (0, Np - N)))
    sp = scale.astype(jnp.float32).reshape(1, N)
    bp = bias.astype(jnp.float32).reshape(1, N)
    if Np != N:
        sp = jnp.pad(sp, ((0, 0), (0, Np - N)))
        bp = jnp.pad(bp, ((0, 0), (0, Np - N)))

    operands = [xb, wb, sp, bp]
    in_specs = [
        pl.BlockSpec((TM, TK), lambda i, j, k: (i, k)),
        pl.BlockSpec((TK, TN), lambda i, j, k: (k, j)),
        pl.BlockSpec((1, TN), lambda i, j, k: (0, j)),
        pl.BlockSpec((1, TN), lambda i, j, k: (0, j)),
    ]
    if residual is not None:
        rp = residual.astype(jnp.float32)
        if (Mp, Np) != (M, N):
            rp = jnp.pad(rp, ((0, Mp - M), (0, Np - N)))
        operands.append(rp)
        in_specs.append(pl.BlockSpec((TM, TN), lambda i, j, k: (i, j)))
        kernel = functools.partial(_mm_res_kernel, relu=relu)
    else:
        kernel = functools.partial(_mm_kernel, relu=relu)

    grid = (Mp // TM, Np // TN, Kp // TK)

    out = pl.pallas_call(
        kernel,
        out_shape=jax.ShapeDtypeStruct((Mp, Np), jnp.float32),
        grid_spec=pltpu.PrefetchScalarGridSpec(
            num_scalar_prefetch=0,
            grid=grid,
            in_specs=in_specs,
            out_specs=pl.BlockSpec((TM, TN), lambda i, j, k: (i, j)),
        ),
        compiler_params=pltpu.CompilerParams(
            dimension_semantics=("parallel", "parallel", "arbitrary")),
    )(*operands)
    if (Mp, Np) != (M, N):
        out = out[:M, :N]
    return out


def matmul_affine(x, w, scale=None, bias=None, relu=False, residual=None):
    """Dispatcher: tiny (latency-bound) matmuls stay in plain jnp; big ones go to Pallas."""
    M, K = x.shape
    _, N = w.shape
    if M < 16 or K < 16 or N < 16:
        y = jnp.dot(x.astype(jnp.float32), w.astype(jnp.float32))
        if scale is not None:
            y = y * scale
        if bias is not None:
            y = y + bias
        if residual is not None:
            y = y + residual
        if relu:
            y = jnp.maximum(y, 0.0)
        return y
    return pallas_matmul_affine(x, w, scale, bias, relu=relu, residual=residual)


def _sk_mix_kernel(d1_ref, d2_ref, a1_ref, a2_ref, o_ref):
    # d blocks: (1, TR, C); a blocks: (1, 1, C) broadcast over rows in-kernel.
    o_ref[...] = d1_ref[...] * a1_ref[...] + d2_ref[...] * a2_ref[...]


def pallas_sk_mix(d1, d2, a1, a2):
    """d1 * a1 + d2 * a2 with per-(batch,channel) attention broadcast over H,W."""
    n, h, w, c = d1.shape
    hw = h * w
    if hw < 8:
        # too small to tile usefully on TPU; plain elementwise path
        return (d1 * a1[:, None, None, :] + d2 * a2[:, None, None, :])

    d1r = d1.reshape(n, hw, c).astype(jnp.float32)
    d2r = d2.reshape(n, hw, c).astype(jnp.float32)
    a1r = a1.reshape(n, 1, c).astype(jnp.float32)
    a2r = a2.reshape(n, 1, c).astype(jnp.float32)

    TR = min(512, _round_up(hw, 8))
    grid = (n, pl.cdiv(hw, TR))

    out = pl.pallas_call(
        _sk_mix_kernel,
        out_shape=jax.ShapeDtypeStruct((n, hw, c), jnp.float32),
        grid_spec=pltpu.PrefetchScalarGridSpec(
            num_scalar_prefetch=0,
            grid=grid,
            in_specs=[
                pl.BlockSpec((1, TR, c), lambda b, r: (b, r, 0)),
                pl.BlockSpec((1, TR, c), lambda b, r: (b, r, 0)),
                pl.BlockSpec((1, 1, c), lambda b, r: (b, 0, 0)),
                pl.BlockSpec((1, 1, c), lambda b, r: (b, 0, 0)),
            ],
            out_specs=pl.BlockSpec((1, TR, c), lambda b, r: (b, r, 0)),
        ),
        compiler_params=pltpu.CompilerParams(
            dimension_semantics=("parallel", "parallel")),
    )(d1r, d2r, a1r, a2r)
    return out.reshape(d1.shape)


# ----------------------------------------------------------------------------
# Conv = im2col (bf16, plain-JAX slicing) + Pallas matmul with fused BN/res/ReLU
# ----------------------------------------------------------------------------
def conv2d_bn_act(x, w, bn_scale, bn_bias, stride=1, padding=0, dilation=1,
                  relu=False, residual=None):
    """x: (N,H,W,Cin) ; w: (Cout,Cin,KH,KW) PyTorch layout; residual: (N,Ho,Wo,Cout)."""
    n, h, ww, cin = x.shape
    cout, cin2, kh, kw = w.shape
    assert cin == cin2
    ho = (h + 2 * padding - dilation * (kh - 1) - 1) // stride + 1
    wo = (ww + 2 * padding - dilation * (kw - 1) - 1) // stride + 1

    if kh == 1 and kw == 1 and padding == 0 and dilation == 1:
        xs = x[:, ::stride, ::stride, :] if stride > 1 else x
        xcol = xs.reshape(n * ho * wo, cin)
    else:
        # TODO(synk): im2col is still materialized in HBM (built in bf16 to halve
        # the traffic); fully fusing the taps into the kernel's K axis would need
        # strided manual DMA that BlockSpec index_maps cannot express.
        xp = jnp.pad(x.astype(jnp.bfloat16),
                     ((0, 0), (padding, padding), (padding, padding), (0, 0)))
        cols = []
        for i in range(kh):
            for j in range(kw):
                hi = i * dilation
                wi = j * dilation
                patch = xp[:, hi:hi + (ho - 1) * stride + 1:stride,
                              wi:wi + (wo - 1) * stride + 1:stride, :]
                cols.append(patch)
        xcol = jnp.concatenate(cols, axis=-1).reshape(n * ho * wo, kh * kw * cin)

    wmat = jnp.transpose(w, (2, 3, 1, 0)).reshape(kh * kw * cin, cout)
    res2 = None if residual is None else residual.reshape(n * ho * wo, cout)
    y = matmul_affine(xcol, wmat, bn_scale, bn_bias, relu=relu, residual=res2)
    return y.reshape(n, ho, wo, cout)


# ----------------------------------------------------------------------------
# Parameter construction (deterministic, synthetic)
# ----------------------------------------------------------------------------
class KeyGen:
    def __init__(self, key):
        self.key = key

    def __call__(self):
        self.key, sub = jax.random.split(self.key)
        return sub


def make_bn(c):
    return dict(gamma=jnp.ones((c,), jnp.float32),
                beta=jnp.zeros((c,), jnp.float32),
                mean=jnp.zeros((c,), jnp.float32),
                var=jnp.ones((c,), jnp.float32))


def bn_scale_bias(bn):
    scale = bn['gamma'] / jnp.sqrt(bn['var'] + BN_EPS)
    bias = bn['beta'] - bn['mean'] * scale
    return scale, bias


def conv_weight(kg, cout, cin, kh, kw):
    fan_out = cout * kh * kw
    std = math.sqrt(2.0 / fan_out)  # kaiming_normal_(mode='fan_out', relu)
    return jax.random.normal(kg(), (cout, cin, kh, kw), jnp.float32) * std


def linear_params(kg, in_f, out_f):
    bound = 1.0 / math.sqrt(in_f)
    w = jax.random.uniform(kg(), (out_f, in_f), jnp.float32, -bound, bound)
    b = jax.random.uniform(kg(), (out_f,), jnp.float32, -bound, bound)
    return dict(w=w, b=b)


def make_att_fc(kg, planes):
    return dict(lin=linear_params(kg, planes // 2, planes),
                ln_g=jnp.ones((planes,), jnp.float32),
                ln_b=jnp.zeros((planes,), jnp.float32))


def make_att_conv(kg, planes):
    return dict(w=conv_weight(kg, 1, 2, 1, 1),
                b=jax.random.uniform(kg(), (1,), jnp.float32,
                                     -1.0 / math.sqrt(2.0), 1.0 / math.sqrt(2.0)),
                ln_g=jnp.ones((planes,), jnp.float32),
                ln_b=jnp.zeros((planes,), jnp.float32))


def make_bottleneck_params(kg, inplanes, planes, stride, has_downsample):
    p = dict(stride=stride, planes=planes)
    p['conv1'] = conv_weight(kg, planes, inplanes, 1, 1)
    p['bn1'] = make_bn(planes)
    p['conv2'] = conv_weight(kg, planes, planes, 3, 3)
    p['bn2'] = make_bn(planes)
    p['conv2g'] = conv_weight(kg, planes, planes, 3, 3)
    p['bn2g'] = make_bn(planes)
    p['conv3'] = conv_weight(kg, planes * 4, planes, 1, 1)
    p['bn3'] = make_bn(planes * 4)
    p['conv_fc1'] = conv_weight(kg, planes // 16, planes, 1, 1)
    p['bn_fc1'] = make_bn(planes // 16)
    p['conv_fc2'] = conv_weight(kg, 2 * planes, planes // 16, 1, 1)
    if inplanes == planes * 2:
        p['att_fc_1'] = make_att_fc(kg, planes)
        p['att_fc_2'] = make_att_fc(kg, planes)
    p['att_conv1'] = make_att_conv(kg, planes)
    p['att_conv2'] = make_att_conv(kg, planes)
    if has_downsample:
        p['ds_conv'] = conv_weight(kg, planes * 4, inplanes, 1, 1)
        p['ds_bn'] = make_bn(planes * 4)
    return p


def make_resnet_params(kg, layers, num_classes):
    params = dict()
    params['conv1'] = conv_weight(kg, 64, 3, 7, 7)
    params['bn1'] = make_bn(64)
    inplanes = 64
    expansion = 4
    for name, planes, stride, nblocks in (('layer1', 64, 1, layers[0]),
                                          ('layer2', 128, 2, layers[1]),
                                          ('layer3', 256, 2, layers[2]),
                                          ('layer4', 512, 2, layers[3])):
        blocks = []
        has_ds = (stride != 1) or (inplanes != planes * expansion)
        blocks.append(make_bottleneck_params(kg, inplanes, planes, stride, has_ds))
        inplanes = planes * expansion
        for _ in range(1, nblocks):
            blocks.append(make_bottleneck_params(kg, inplanes, planes, 1, False))
        params[name] = blocks
    params['fc'] = linear_params(kg, 512 * expansion, num_classes)
    return params


# ----------------------------------------------------------------------------
# Forward pass
# ----------------------------------------------------------------------------
def layernorm(x, g, b):
    mu = jnp.mean(x, axis=-1, keepdims=True)
    var = jnp.mean((x - mu) ** 2, axis=-1, keepdims=True)
    return (x - mu) / jnp.sqrt(var + LN_EPS) * g + b


def att_fc_forward(p, x):
    # Linear + LayerNorm + ReLU (M == batch -> latency-bound, plain jnp path)
    y = matmul_affine(x, p['lin']['w'].T, bias=p['lin']['b'])
    return jnp.maximum(layernorm(y, p['ln_g'], p['ln_b']), 0.0)


def att_conv_forward(p, gap, pre_gap):
    # Conv2d(2 -> 1, kernel 1) over the branch axis + LayerNorm(planes) + ReLU
    w = p['w'][0, :, 0, 0]  # (2,)
    y = w[0] * gap + w[1] * pre_gap + p['b'][0]
    return jnp.maximum(layernorm(y, p['ln_g'], p['ln_b']), 0.0)


def bottleneck_forward(p, x, pre_att):
    stride = p['stride']

    s1, b1 = bn_scale_bias(p['bn1'])
    out = conv2d_bn_act(x, p['conv1'], s1, b1, stride=1, padding=0, relu=True)

    s2, b2 = bn_scale_bias(p['bn2'])
    d1 = conv2d_bn_act(out, p['conv2'], s2, b2, stride=stride, padding=1,
                       dilation=1, relu=True)
    s2g, b2g = bn_scale_bias(p['bn2g'])
    d2 = conv2d_bn_act(out, p['conv2g'], s2g, b2g, stride=stride, padding=2,
                       dilation=2, relu=True)

    n, ho, wo, c = d1.shape
    gap1_raw = jnp.mean(d1, axis=(1, 2))  # (N, C)
    gap2_raw = jnp.mean(d2, axis=(1, 2))
    gap1, gap2 = gap1_raw, gap2_raw

    if pre_att is not None:
        pre_gap1 = pre_att[:, :, 0]
        pre_gap2 = pre_att[:, :, 1]
        if 'att_fc_1' in p:
            pre_gap1 = att_fc_forward(p['att_fc_1'], pre_gap1)
            pre_gap2 = att_fc_forward(p['att_fc_2'], pre_gap2)
        gap1 = att_conv_forward(p['att_conv1'], gap1, pre_gap1)
        gap2 = att_conv_forward(p['att_conv2'], gap2, pre_gap2)

    d = gap1 + gap2  # (N, C)
    sf1, bf1 = bn_scale_bias(p['bn_fc1'])
    wfc1 = p['conv_fc1'][:, :, 0, 0].T  # (C, C//16)
    d = matmul_affine(d, wfc1, sf1, bf1, relu=True)
    wfc2 = p['conv_fc2'][:, :, 0, 0].T  # (C//16, 2C)
    d = matmul_affine(d, wfc2)
    d = d.reshape(n, 2, c)
    d = jax.nn.softmax(d, axis=1)
    a1 = d[:, 0, :]
    a2 = d[:, 1, :]

    dsum = pallas_sk_mix(d1, d2, a1, a2)  # d1*a1 + d2*a2 (tiled Pallas elementwise)

    # Residual branch (possibly downsampled), then fused into the conv3 epilogue.
    if 'ds_conv' in p:
        sd, bd = bn_scale_bias(p['ds_bn'])
        identity = conv2d_bn_act(x, p['ds_conv'], sd, bd, stride=stride,
                                 padding=0, relu=False)
    else:
        identity = x

    s3, b3 = bn_scale_bias(p['bn3'])
    out = conv2d_bn_act(dsum, p['conv3'], s3, b3, stride=1, padding=0,
                        relu=True, residual=identity)

    # avg_pool(d1*a1) == a1 * avg_pool(d1) since a1 is constant over H,W.
    att = jnp.stack([a1 * gap1_raw, a2 * gap2_raw], axis=-1)  # (N, C, 2)
    return out, att


def resnet_forward(params, x_nchw):
    x = jnp.transpose(x_nchw.astype(jnp.float32), (0, 2, 3, 1))  # NCHW -> NHWC

    s1, b1 = bn_scale_bias(params['bn1'])
    x = conv2d_bn_act(x, params['conv1'], s1, b1, stride=2, padding=3, relu=True)

    # MaxPool 3x3 stride 2 pad 1 (glue)
    x = lax.reduce_window(x, -jnp.inf, lax.max,
                          (1, 3, 3, 1), (1, 2, 2, 1),
                          ((0, 0), (1, 1), (1, 1), (0, 0)))

    att = None
    for layer in ('layer1', 'layer2', 'layer3', 'layer4'):
        for bp in params[layer]:
            x, att = bottleneck_forward(bp, x, att)

    x = jnp.mean(x, axis=(1, 2))  # global avg pool -> (N, 2048)
    y = matmul_affine(x, params['fc']['w'].T, bias=params['fc']['b'])
    return y


if __name__ == "__main__":
    kg = KeyGen(jax.random.PRNGKey(0))
    LAYERS = [1, 1, 1, 1]   # small Bottleneck ResNet
    NUM_CLASSES = 10
    params = make_resnet_params(kg, LAYERS, NUM_CLASSES)

    x = jax.random.normal(jax.random.PRNGKey(0), (2, 3, 32, 32), jnp.float32)

    out = resnet_forward(params, x)
    out = jax.block_until_ready(out)
    assert out.shape == (2, NUM_CLASSES)
    assert jnp.all(jnp.isfinite(out))
    print("KERNEL_OK")
</pallas_src>

<mosaic_0001>
module attributes {stable_mosaic.version = 11 : i64} {
  func.func @_mm_kernel(%arg0: i32, %arg1: i32, %arg2: i32, %arg3: memref<512x128xbf16, #tpu.memory_space<vmem>>, %arg4: memref<128x128xbf16, #tpu.memory_space<vmem>>, %arg5: memref<1x128xf32, #tpu.memory_space<vmem>>, %arg6: memref<1x128xf32, #tpu.memory_space<vmem>>, %arg7: memref<512x128xf32, #tpu.memory_space<vmem>>) attributes {dimension_semantics = [#tpu.dimension_semantics<parallel>, #tpu.dimension_semantics<parallel>, #tpu.dimension_semantics<arbitrary>], iteration_bounds = array<i64: 1, 1, 2>, scalar_prefetch = 0 : i64, scratch_operands = 0 : i64, tpu.core_type = #tpu.core_type<tc>, window_params = [{transform_indices = @transform_0, window_bounds = array<i64: 512, 128>}, {transform_indices = @transform_1, window_bounds = array<i64: 128, 128>}, {transform_indices = @transform_2, window_bounds = array<i64: 1, 128>}, {transform_indices = @transform_3, window_bounds = array<i64: 1, 128>}, {transform_indices = @transform_4, window_bounds = array<i64: 512, 128>}]} {
    %c0_i32 = arith.constant 0 : i32
    %0 = arith.cmpi eq, %arg2, %c0_i32 : i32
    %1 = arith.extui %0 : i1 to i32
    %c0_i32_0 = arith.constant 0 : i32
    %2 = arith.cmpi ne, %1, %c0_i32_0 : i32
    scf.if %2 {
      %cst_9 = arith.constant 0.000000e+00 : f32
      %12 = vector.broadcast %cst_9 : f32 to vector<512x128xf32>
      %c0_10 = arith.constant 0 : index
      %c0_11 = arith.constant 0 : index
      %13 = vector.load %arg7[%c0_10, %c0_11] : memref<512x128xf32, #tpu.memory_space<vmem>>, vector<512x128xf32>
      tpu.vector_store %arg7[%c0_10, %c0_11], %12 {strides = array<i32>} : memref<512x128xf32, #tpu.memory_space<vmem>>, vector<512x128xf32>,
    } else {
    }
    %c0 = arith.constant 0 : index
    %c0_1 = arith.constant 0 : index
    %3 = vector.load %arg7[%c0, %c0_1] : memref<512x128xf32, #tpu.memory_space<vmem>>, vector<512x128xf32>
    %c0_2 = arith.constant 0 : index
    %c0_3 = arith.constant 0 : index
    %4 = vector.load %arg3[%c0_2, %c0_3] : memref<512x128xbf16, #tpu.memory_space<vmem>>, vector<512x128xbf16>
    %c0_4 = arith.constant 0 : index
    %c0_5 = arith.constant 0 : index
    %5 = vector.load %arg4[%c0_4, %c0_5] : memref<128x128xbf16, #tpu.memory_space<vmem>>, vector<128x128xbf16>
    %cst = arith.constant dense<0.000000e+00> : vector<512x128xf32>
    %6 = tpu.matmul %4, %5, %cst {dimension_numbers = #tpu.dot_dimension_numbers<[1], [0], [0], [1], [0, 0, 1, 1], [], []>} : vector<512x128xbf16>, vector<128x128xbf16>, vector<512x128xf32> -> vector<512x128xf32>
    %7 = arith.addf %3, %6 : vector<512x128xf32>
    %c0_6 = arith.constant 0 : index
    %c0_7 = arith.constant 0 : index
    %8 = vector.load %arg7[%c0_6, %c0_7] : memref<512x128xf32, #tpu.memory_space<vmem>>, vector<512x128xf32>
    tpu.vector_store %arg7[%c0_6, %c0_7], %7 {strides = array<i32>} : memref<512x128xf32, #tpu.memory_space<vmem>>, vector<512x128xf32>,
    %c1_i32 = arith.constant 1 : i32
    %9 = arith.cmpi eq, %arg2, %c1_i32 : i32
    %10 = arith.extui %9 : i1 to i32
    %c0_i32_8 = arith.constant 0 : i32
    %11 = arith.cmpi ne, %10, %c0_i32_8 : i32
    scf.if %11 {
      %c0_9 = arith.constant 0 : index
      %c0_10 = arith.constant 0 : index
      %12 = vector.load %arg7[%c0_9, %c0_10] : memref<512x128xf32, #tpu.memory_space<vmem>>, vector<512x128xf32>
      %c0_11 = arith.constant 0 : index
      %c0_12 = arith.constant 0 : index
      %13 = vector.load %arg5[%c0_11, %c0_12] : memref<1x128xf32, #tpu.memory_space<vmem>>, vector<1x128xf32>
      %14 = vector.broadcast %13 : vector<1x128xf32> to vector<512x128xf32>
      %15 = arith.mulf %12, %14 : vector<512x128xf32>
      %c0_13 = arith.constant 0 : index
      %c0_14 = arith.constant 0 : index
      %16 = vector.load %arg6[%c0_13, %c0_14] : memref<1x128xf32, #tpu.memory_space<vmem>>, vector<1x128xf32>
      %17 = vector.broadcast %16 : vector<1x128xf32> to vector<512x128xf32>
      %18 = arith.addf %15, %17 : vector<512x128xf32>
      %cst_15 = arith.constant 0.000000e+00 : f32
      %19 = vector.broadcast %cst_15 : f32 to vector<512x128xf32>
      %20 = arith.maximumf %18, %19 : vector<512x128xf32>
      %c0_16 = arith.constant 0 : index
      %c0_17 = arith.constant 0 : index
      %21 = vector.load %arg7[%c0_16, %c0_17] : memref<512x128xf32, #tpu.memory_space<vmem>>, vector<512x128xf32>
      tpu.vector_store %arg7[%c0_16, %c0_17], %20 {strides = array<i32>} : memref<512x128xf32, #tpu.memory_space<vmem>>, vector<512x128xf32>,
    } else {
    }
    return
  }
  func.func @transform_0(%arg0: i32, %arg1: i32, %arg2: i32) -> (i32, i32) {
    %c0_i32 = arith.constant 0 : i32
    return %arg0, %arg2 : i32, i32
  }
  func.func @transform_1(%arg0: i32, %arg1: i32, %arg2: i32) -> (i32, i32) {
    %c0_i32 = arith.constant 0 : i32
    return %arg2, %arg1 : i32, i32
  }
  func.func @transform_2(%arg0: i32, %arg1: i32, %arg2: i32) -> (i32, i32) {
    %c0_i32 = arith.constant 0 : i32
    %c0_i32_0 = arith.constant 0 : i32
    return %c0_i32, %arg1 : i32, i32
  }
  func.func @transform_3(%arg0: i32, %arg1: i32, %arg2: i32) -> (i32, i32) {
    %c0_i32 = arith.constant 0 : i32
    %c0_i32_0 = arith.constant 0 : i32
    return %c0_i32, %arg1 : i32, i32
  }
  func.func @transform_4(%arg0: i32, %arg1: i32, %arg2: i32) -> (i32, i32) {
    %c0_i32 = arith.constant 0 : i32
    return %arg0, %arg1 : i32, i32
  }
}

</mosaic_0001>

<bundles_post_ra>
// kernel: tpu_custom_call.1
= control target key start
LH: loop header
LB: loop body
LE: loop exit
PB: predicated region body
PF: predicated region fallthrough
CT: control target
= control target key end

     0   :  { %9 = vsyncpa [#allocation3], 0  ;;  %s2387_s0 = inlined_call_operand.hbm [shape: bf16[512,256], index: 0, kind: input, shape index: {}]   ;;  %s2388_s1 = inlined_call_operand.hbm [shape: bf16[256,128], index: 1, kind: input, shape index: {}]   ;;  %s2389_s2 = inlined_call_operand.vmem [shape: f32[1,128], index: 2, kind: input, shape index: {}]   ;;  %s2390_s3 = inlined_call_operand.vmem [shape: f32[1,128], index: 3, kind: input, shape index: {}]   ;;  %s2391_s4 = inlined_call_operand.hbm [shape: f32[512,128], index: 4, kind: output, shape index: {}]  }
   0x1   :  { %11 = vsyncpa [#allocation3 + $0x1], 0 }
   0x2   :  { %12 = vsyncpa [#allocation6], 0 }
   0x3   :  { %14 = vsyncpa [#allocation6 + $0x1], 0 }
   0x4   :  { %15 = vsyncpa [#allocation4], 0  ;;  %s2024_s15 = smov 0   ;;  %s2026_s16 = smov 0  }
   0x5   :  { %s2028_s17 = smov 0   ;;  %s2030_s18 = smov 0  }
   0x6   :  { %s2032_s19 = smov 0   ;;  %s2034_s20 = smov 0  }
   0x7 LB: > { %s1525_s21 = sadd.s32 4294967295, %s1990_s20   ;;  %s33_s22 = sadd.s32 1, %s1986_s19  ;;  %s1990_s20 = sphi %s2034_s20, %s21_s20   ;;  %s1986_s19 = sphi %s2032_s19, %s2399_s19   ;;  %s1982_s18 = sphi %s2030_s18, %s2398_s18   ;;  %s1978_s17 = sphi %s2028_s17, %s2397_s17   ;;  %s1974_s16 = sphi %s2026_s16, %s2396_s16   ;;  %s1970_s15 = sphi %s2024_s15, %s2395_s15  }
   0x8   : > { %p34_p0 = scmp.ge.s32.totalorder %s33_s22, 2  ;;  %s49_s23 = sadd.s32 1, %s1978_s17 }
   0x9   : > { %p56_p1 = scmp.ne.s32.totalorder %s1978_s17, %s1974_s16  ;;  %p57_p2 = scmp.eq.s32.totalorder %s1990_s20, 0 }
   0xa   : > { %s2401_s22 = smov (%p34_p0, %s33_s22), 0  ;;  %p62_p4 = scmp.ne.s32.totalorder %s1974_s16, %s1970_s15 }
   0xb   : > { %p2060_p3 = por %p57_p2, %p56_p1  ;;  %s45_s25 = ssub.s32 %s1986_s19, %s2401_s22 }
   0xc   : > { %p63_p5 = scmp.eq.s32.totalorder %s1525_s21, 0  ;;  %p47_p6 = scmp.eq.s32.totalorder %s45_s25, 0 }
   0xd   : > { %p1784_p8 = scmp.lt.s32.totalorder %s1990_s20, 2  ;;  %s2078_s28 = sand.u32 1, %s1978_s17  }
   0xe   : > { %p2069_p7 = por %p63_p5, %p62_p4  ;;  %s1531_s29 = sshll.u32 %s1986_s19, 2 }
   0xf   : > { %s2075_s27 = scalar_select %p47_p6, %s1978_s17, %s49_s23  }
  0x10   : > { %s1530_s30 = sshll.u32 %s2078_s28, 8  ;;  %s217_s7 = scalar_lea.hbm %s2387_s0, %s1531_s29 }
  0x11   : > { %s218_s8 = sshll.u32 %s217_s7, 4  ;;  %s210_s9 = scalar_lea.vmem [#allocation2], %s1530_s30  ;;  %s219_s8 = int_to_ptr.hbm [resolvable:$true] %s218_s8 }
  0x12   : > { %s220_s10 = sshll.u32 %s210_s9, 4  ;;  %p2087_p9 = pnand %p1784_p8, %p2060_p3  ;;  %s221_s10 = int_to_ptr.vmem [resolvable:$true] %s220_s10 }
  0x13   : > { %p1535_p10 = scmp.ge.s32.totalorder %s1990_s20, 1  ;;  %s207_s12 = scalar_lea.sflag [#allocation3], %s2078_s28 }
  0x14   : > { %s1992_s13 = smov 128   ;;  %s1993_s14 = smov 64  }
  0x15   : > { %s1994_s15 = smov 4   ;;  %p251_p11 = scmp.lt.s32.totalorder %s1990_s20, 3 }
  0x16   : > { %1780 = dma.hbm_to_vmem [thread:$0]  (!%p2087_p9), %s219_s8, 4096, %s221_s10, %s207_s12, %s1992_s13, %s1993_s14, %s1994_s15  }
  0x17   : > { %s1532_s23 = sshll.u32 %s2078_s28, 6  ;;  %s1704_s25 = sshll.u32 %s1986_s19, 6 }
  0x18   : > { %p252_p12 = pnand %p1535_p10, %p251_p11  ;;  %s240_s30 = scalar_lea.hbm %s2388_s1, %s1704_s25 }
  0x19   : > { %s234_s5 = scalar_lea.vmem [#allocation5], %s1532_s23  ;;  %s241_s7 = sshll.u32 %s240_s30, 4  ;;  %s242_s7 = int_to_ptr.hbm [resolvable:$true] %s241_s7 }
  0x1a   : > { %s243_s6 = sshll.u32 %s234_s5, 4  ;;  %s231_s9 = scalar_lea.sflag [#allocation6], %s2078_s28  ;;  %s244_s6 = int_to_ptr.vmem [resolvable:$true] %s243_s6 }
  0x1b   : > { %1783 = dma.hbm_to_vmem [thread:$0]  (!%p2087_p9), %s242_s7, 1024, %s244_s6, %s231_s9, %s1993_s14, %s1993_s14, %s1994_s15  }
  0x1c   : > { %255 = sbr.rel (%p252_p12) target bundleno = 476 (0x1dc), region = 36  ;;  %s257_s8 = sand.u32 (!%p252_p12), 1, %s1974_s16  }
  0x1d   : > { %s1536_s10 = sshll.u32 (!%p252_p12), %s257_s8, 8  ;;  %s258_s12 = scalar_lea.sflag (!%p252_p12), [#allocation3], %s257_s8 }
  0x1e   : > { %s2105_s13 = scalar_lea.vmem (!%p252_p12), [#allocation2], %s1536_s10 }
  0x21   : > { %1957 = dma.done.wait (%p2069_p7), %s258_s12, 4096  }
  0x22   : > { %1959 = vsyncadd (%p2069_p7), %s258_s12, 4294963200  ;;  %s1537_s23 = sshll.u32 %s257_s8, 6  ;;  %s268_s25 = scalar_lea.sflag [#allocation6], %s257_s8 }
  0x23   : > { %s2111_s29 = scalar_lea.vmem [#allocation5], %s1537_s23 }
  0x24   : > { %1961 = dma.done.wait (%p2069_p7), %s268_s25, 1024  }
  0x25   : > { %1963 = vsyncadd (%p2069_p7), %s268_s25, 4294966272  ;;  %p1538_p13 = scmp.ne.s32.totalorder %s1982_s18, 0 }
  0x27   : > { %315 = sbr.rel (%p1538_p13) target bundleno = 109 (0x6d), region = 48 }
  0x2c   : > { %v1995_v0 = vmov 0.0  }
  0x2d   : > { %316 = vst [vmem:[#allocation7] sm:$0xff] %v1995_v0 }
  0x2e   : > { %317 = vst [vmem:[#allocation7 + $0x8] sm:$0xff] %v1995_v0 }
  0x2f   : > { %318 = vst [vmem:[#allocation7 + $0x10] sm:$0xff] %v1995_v0 }
  0x30   : > { %319 = vst [vmem:[#allocation7 + $0x18] sm:$0xff] %v1995_v0 }
  0x31   : > { %320 = vst [vmem:[#allocation7 + $0x20] sm:$0xff] %v1995_v0 }
  0x32   : > { %321 = vst [vmem:[#allocation7 + $0x28] sm:$0xff] %v1995_v0 }
  0x33   : > { %322 = vst [vmem:[#allocation7 + $0x30] sm:$0xff] %v1995_v0 }
  0x34   : > { %323 = vst [vmem:[#allocation7 + $0x38] sm:$0xff] %v1995_v0 }
  0x35   : > { %324 = vst [vmem:[#allocation7 + $0x40] sm:$0xff] %v1995_v0 }
  0x36   : > { %325 = vst [vmem:[#allocation7 + $0x48] sm:$0xff] %v1995_v0 }
  0x37   : > { %326 = vst [vmem:[#allocation7 + $0x50] sm:$0xff] %v1995_v0 }
  0x38   : > { %327 = vst [vmem:[#allocation7 + $0x58] sm:$0xff] %v1995_v0 }
  0x39   : > { %328 = vst [vmem:[#allocation7 + $0x60] sm:$0xff] %v1995_v0 }
  0x3a   : > { %329 = vst [vmem:[#allocation7 + $0x68] sm:$0xff] %v1995_v0 }
  0x3b   : > { %330 = vst [vmem:[#allocation7 + $0x70] sm:$0xff] %v1995_v0 }
  0x3c   : > { %331 = vst [vmem:[#allocation7 + $0x78] sm:$0xff] %v1995_v0 }
  0x3d   : > { %332 = vst [vmem:[#allocation7 + $0x80] sm:$0xff] %v1995_v0 }
  0x3e   : > { %333 = vst [vmem:[#allocation7 + $0x88] sm:$0xff] %v1995_v0 }
  0x3f   : > { %334 = vst [vmem:[#allocation7 + $0x90] sm:$0xff] %v1995_v0 }
  0x40   : > { %335 = vst [vmem:[#allocation7 + $0x98] sm:$0xff] %v1995_v0 }
  0x41   : > { %336 = vst [vmem:[#allocation7 + $0xa0] sm:$0xff] %v1995_v0 }
  0x42   : > { %337 = vst [vmem:[#allocation7 + $0xa8] sm:$0xff] %v1995_v0 }
  0x43   : > { %338 = vst [vmem:[#allocation7 + $0xb0] sm:$0xff] %v1995_v0 }
  0x44   : > { %339 = vst [vmem:[#allocation7 + $0xb8] sm:$0xff] %v1995_v0 }
  0x45   : > { %340 = vst [vmem:[#allocation7 + $0xc0] sm:$0xff] %v1995_v0 }
  0x46   : > { %341 = vst [vmem:[#allocation7 + $0xc8] sm:$0xff] %v1995_v0 }
  0x47   : > { %342 = vst [vmem:[#allocation7 + $0xd0] sm:$0xff] %v1995_v0 }
  0x48   : > { %343 = vst [vmem:[#allocation7 + $0xd8] sm:$0xff] %v1995_v0 }
  0x49   : > { %344 = vst [vmem:[#allocation7 + $0xe0] sm:$0xff] %v1995_v0 }
  0x4a   : > { %345 = vst [vmem:[#allocation7 + $0xe8] sm:$0xff] %v1995_v0 }
  0x4b   : > { %346 = vst [vmem:[#allocation7 + $0xf0] sm:$0xff] %v1995_v0 }
  0x4c   : > { %347 = vst [vmem:[#allocation7 + $0xf8] sm:$0xff] %v1995_v0 }
  0x4d   : > { %348 = vst [vmem:[#allocation7 + $0x100] sm:$0xff] %v1995_v0 }
  0x4e   : > { %349 = vst [vmem:[#allocation7 + $0x108] sm:$0xff] %v1995_v0 }
  0x4f   : > { %350 = vst [vmem:[#allocation7 + $0x110] sm:$0xff] %v1995_v0 }
  0x50   : > { %351 = vst [vmem:[#allocation7 + $0x118] sm:$0xff] %v1995_v0 }
  0x51   : > { %352 = vst [vmem:[#allocation7 + $0x120] sm:$0xff] %v1995_v0 }
  0x52   : > { %353 = vst [vmem:[#allocation7 + $0x128] sm:$0xff] %v1995_v0 }
  0x53   : > { %354 = vst [vmem:[#allocation7 + $0x130] sm:$0xff] %v1995_v0 }
  0x54   : > { %355 = vst [vmem:[#allocation7 + $0x138] sm:$0xff] %v1995_v0 }
  0x55   : > { %356 = vst [vmem:[#allocation7 + $0x140] sm:$0xff] %v1995_v0 }
  0x56   : > { %357 = vst [vmem:[#allocation7 + $0x148] sm:$0xff] %v1995_v0 }
  0x57   : > { %358 = vst [vmem:[#allocation7 + $0x150] sm:$0xff] %v1995_v0 }
  0x58   : > { %359 = vst [vmem:[#allocation7 + $0x158] sm:$0xff] %v1995_v0 }
  0x59   : > { %360 = vst [vmem:[#allocation7 + $0x160] sm:$0xff] %v1995_v0 }
  0x5a   : > { %361 = vst [vmem:[#allocation7 + $0x168] sm:$0xff] %v1995_v0 }
  0x5b   : > { %362 = vst [vmem:[#allocation7 + $0x170] sm:$0xff] %v1995_v0 }
  0x5c   : > { %363 = vst [vmem:[#allocation7 + $0x178] sm:$0xff] %v1995_v0 }
  0x5d   : > { %364 = vst [vmem:[#allocation7 + $0x180] sm:$0xff] %v1995_v0 }
  0x5e   : > { %365 = vst [vmem:[#allocation7 + $0x188] sm:$0xff] %v1995_v0 }
  0x5f   : > { %366 = vst [vmem:[#allocation7 + $0x190] sm:$0xff] %v1995_v0 }
  0x60   : > { %367 = vst [vmem:[#allocation7 + $0x198] sm:$0xff] %v1995_v0 }
  0x61   : > { %368 = vst [vmem:[#allocation7 + $0x1a0] sm:$0xff] %v1995_v0 }
  0x62   : > { %369 = vst [vmem:[#allocation7 + $0x1a8] sm:$0xff] %v1995_v0 }
  0x63   : > { %370 = vst [vmem:[#allocation7 + $0x1b0] sm:$0xff] %v1995_v0 }
  0x64   : > { %371 = vst [vmem:[#allocation7 + $0x1b8] sm:$0xff] %v1995_v0 }
  0x65   : > { %372 = vst [vmem:[#allocation7 + $0x1c0] sm:$0xff] %v1995_v0 }
  0x66   : > { %373 = vst [vmem:[#allocation7 + $0x1c8] sm:$0xff] %v1995_v0 }
  0x67   : > { %374 = vst [vmem:[#allocation7 + $0x1d0] sm:$0xff] %v1995_v0 }
  0x68   : > { %375 = vst [vmem:[#allocation7 + $0x1d8] sm:$0xff] %v1995_v0 }
  0x69   : > { %376 = vst [vmem:[#allocation7 + $0x1e0] sm:$0xff] %v1995_v0 }
  0x6a   : > { %377 = vst [vmem:[#allocation7 + $0x1e8] sm:$0xff] %v1995_v0 }
  0x6b   : > { %378 = vst [vmem:[#allocation7 + $0x1f0] sm:$0xff] %v1995_v0 }
  0x6c   : > { %379 = vst [vmem:[#allocation7 + $0x1f8] sm:$0xff] %v1995_v0 }
  0x6d PF: > { %v1744_v1 = vld [vmem:[%s2111_s29 + $0x38] sm:$0xff]  ;;  %v1743_v2 = vld [vmem:[%s2111_s29 + $0x30] sm:$0xff]  ;;  %v1742_v3 = vld [vmem:[%s2111_s29 + $0x28] sm:$0xff]  ;;  %p1699_p0 = scmp.ne.s32.totalorder %s1982_s18, 1 }
  0x6e   : > { %764 = vmatpush.bf16.msra.mxu0 %v1744_v1  ;;  %1745 = vmatpush.bf16.msra.mxu1 %v1744_v1  ;;  %v1741_v4 = vld [vmem:[%s2111_s29 + $0x20] sm:$0xff]  ;;  %v1740_v5 = vld [vmem:[%s2111_s29 + $0x18] sm:$0xff]  ;;  %v1739_v6 = vld [vmem:[%s2111_s29 + $0x10] sm:$0xff] }
  0x6f   : > { %1746 = vmatpush.bf16.msra.mxu2 %v1744_v1  ;;  %1747 = vmatpush.bf16.msra.mxu3 %v1744_v1  ;;  %v1738_v7 = vld [vmem:[%s2111_s29 + $0x8] sm:$0xff]  ;;  %v1737_v8 = vld [vmem:[%s2111_s29] sm:$0xff]  ;;  %v1707_v17 = vld [vmem:[%s2105_s13 + $0x10] sm:$0xff] }
  0x70   : > { %v1705_v9 = vld [vmem:[%s2105_s13] sm:$0xff]  ;;  %v1706_v13 = vld [vmem:[%s2105_s13 + $0x8] sm:$0xff]  ;;  %v1715_v18 = vld [vmem:[%s2105_s13 + $0x50] sm:$0xff] }
  0x71   : > { %v1713_v10 = vld [vmem:[%s2105_s13 + $0x40] sm:$0xff]  ;;  %v1714_v14 = vld [vmem:[%s2105_s13 + $0x48] sm:$0xff]  ;;  %v1723_v19 = vld [vmem:[%s2105_s13 + $0x90] sm:$0xff] }
  0x72   : > { %765 = vmatpush.bf16.msra.mxu0 %v1743_v2  ;;  %1748 = vmatpush.bf16.msra.mxu1 %v1743_v2  ;;  %v1721_v11 = vld [vmem:[%s2105_s13 + $0x80] sm:$0xff]  ;;  %v1722_v15 = vld [vmem:[%s2105_s13 + $0x88] sm:$0xff]  ;;  %v1731_v20 = vld [vmem:[%s2105_s13 + $0xd0] sm:$0xff] }
  0x73   : > { %1749 = vmatpush.bf16.msra.mxu2 %v1743_v2  ;;  %1750 = vmatpush.bf16.msra.mxu3 %v1743_v2  ;;  %v1729_v12 = vld [vmem:[%s2105_s13 + $0xc0] sm:$0xff]  ;;  %v1730_v16 = vld [vmem:[%s2105_s13 + $0xc8] sm:$0xff]  ;;  %v1708_v21 = vld [vmem:[%s2105_s13 + $0x18] sm:$0xff] }
  0x74   : > { %v1716_v22 = vld [vmem:[%s2105_s13 + $0x58] sm:$0xff]  ;;  %v1709_v25 = vld [vmem:[%s2105_s13 + $0x20] sm:$0xff]  ;;  %v1710_v29 = vld [vmem:[%s2105_s13 + $0x28] sm:$0xff] }
  0x75   : > { %v1724_v23 = vld [vmem:[%s2105_s13 + $0x98] sm:$0xff]  ;;  %v1717_v26 = vld [vmem:[%s2105_s13 + $0x60] sm:$0xff]  ;;  %v1718_v30 = vld [vmem:[%s2105_s13 + $0x68] sm:$0xff] }
  0x76   : > { %766 = vmatpush.bf16.msra.mxu0 %v1742_v3  ;;  %1751 = vmatpush.bf16.msra.mxu1 %v1742_v3  ;;  %v1732_v24 = vld [vmem:[%s2105_s13 + $0xd8] sm:$0xff]  ;;  %v1725_v27 = vld [vmem:[%s2105_s13 + $0xa0] sm:$0xff]  ;;  %v1726_v31 = vld [vmem:[%s2105_s13 + $0xa8] sm:$0xff] }
  0x77   : > { %1752 = vmatpush.bf16.msra.mxu2 %v1742_v3  ;;  %1753 = vmatpush.bf16.msra.mxu3 %v1742_v3  ;;  %v1733_v28 = vld [vmem:[%s2105_s13 + $0xe0] sm:$0xff]  ;;  %v1734_v32 = vld [vmem:[%s2105_s13 + $0xe8] sm:$0xff]  ;;  %v1711_v33 = vld [vmem:[%s2105_s13 + $0x30] sm:$0xff] }
  0x78   : > { %v1719_v34 = vld [vmem:[%s2105_s13 + $0x70] sm:$0xff]  ;;  %v1712_v37 = vld [vmem:[%s2105_s13 + $0x38] sm:$0xff]  ;;  %v380_v41 = vld [vmem:[#allocation7] sm:$0xff] }
  0x79   : > { %v1727_v35 = vld [vmem:[%s2105_s13 + $0xb0] sm:$0xff]  ;;  %v1720_v38 = vld [vmem:[%s2105_s13 + $0x78] sm:$0xff]  ;;  %v396_v42 = vld [vmem:[#allocation7 + $0x80] sm:$0xff] }
  0x7a   : > { %767 = vmatpush.bf16.msra.mxu0 %v1741_v4  ;;  %1754 = vmatpush.bf16.msra.mxu1 %v1741_v4  ;;  %v1735_v36 = vld [vmem:[%s2105_s13 + $0xf0] sm:$0xff]  ;;  %v1728_v39 = vld [vmem:[%s2105_s13 + $0xb8] sm:$0xff]  ;;  %v412_v47 = vld [vmem:[#allocation7 + $0x100] sm:$0xff] }
  0x7b   : > { %1755 = vmatpush.bf16.msra.mxu2 %v1741_v4  ;;  %1756 = vmatpush.bf16.msra.mxu3 %v1741_v4  ;;  %v1736_v40 = vld [vmem:[%s2105_s13 + $0xf8] sm:$0xff]  ;;  %v428_v48 = vld [vmem:[#allocation7 + $0x180] sm:$0xff]  ;;  %v381_v49 = vld [vmem:[#allocation7 + $0x8] sm:$0xff] }
  0x7c   : > { %v397_v50 = vld [vmem:[#allocation7 + $0x88] sm:$0xff]  ;;  %v382_v61 = vld [vmem:[#allocation7 + $0x10] sm:$0xff] }
  0x7d   : > { %v413_v59 = vld [vmem:[#allocation7 + $0x108] sm:$0xff]  ;;  %v398_v62 = vld [vmem:[#allocation7 + $0x90] sm:$0xff] }
  0x7e   : > { %768 = vmatpush.bf16.msra.mxu0 %v1740_v5  ;;  %1757 = vmatpush.bf16.msra.mxu1 %v1740_v5  ;;  %v429_v60 = vld [vmem:[#allocation7 + $0x188] sm:$0xff] }
  0x7f   : > { %1758 = vmatpush.bf16.msra.mxu2 %v1740_v5  ;;  %1759 = vmatpush.bf16.msra.mxu3 %v1740_v5 }
  0x82   : > { %769 = vmatpush.bf16.msra.mxu0 %v1739_v6  ;;  %1760 = vmatpush.bf16.msra.mxu1 %v1739_v6 }
  0x83   : > { %1761 = vmatpush.bf16.msra.mxu2 %v1739_v6  ;;  %1762 = vmatpush.bf16.msra.mxu3 %v1739_v6 }
  0x86   : > { %770 = vmatpush.bf16.msra.mxu0 %v1738_v7  ;;  %1763 = vmatpush.bf16.msra.mxu1 %v1738_v7 }
  0x87   : > { %1764 = vmatpush.bf16.msra.mxu2 %v1738_v7  ;;  %1765 = vmatpush.bf16.msra.mxu3 %v1738_v7  ;;  %v414_v7 = vld [vmem:[#allocation7 + $0x110] sm:$0xff] }
  0x8a   : > { %771 = vmatpush.bf16.msra.mxu0 %v1737_v8  ;;  %1766 = vmatpush.bf16.msra.mxu1 %v1737_v8 }
  0x8b   : > { %1767 = vmatpush.bf16.msra.mxu2 %v1737_v8  ;;  %1768 = vmatpush.bf16.msra.mxu3 %v1737_v8  ;;  %v430_v8 = vld [vmem:[#allocation7 + $0x190] sm:$0xff] }
  0x8d   : > { %772 = vmatmul.bf16.vlgmr.msra.gmra.mxu0 %v1705_v9  ;;  %812 = vmatmul.bf16.vlgmr.msra.gmra.mxu1 %v1713_v10  ;;  %v383_v9 = vld [vmem:[#allocation7 + $0x18] sm:$0xff] }
  0x8e   : > { %852 = vmatmul.bf16.vlgmr.msra.gmra.mxu2 %v1721_v11  ;;  %892 = vmatmul.bf16.vlgmr.msra.gmra.mxu3 %v1729_v12  ;;  %v399_v10 = vld [vmem:[#allocation7 + $0x98] sm:$0xff] }
  0x9d   : > { %777 = vmatmul.bf16.gmra.mxu0 %v1706_v13  ;;  %817 = vmatmul.bf16.gmra.mxu1 %v1714_v14 }
  0x9e   : > { %857 = vmatmul.bf16.gmra.mxu2 %v1722_v15  ;;  %897 = vmatmul.bf16.gmra.mxu3 %v1730_v16 }
  0xad   : > { %782 = vmatmul.bf16.gmra.mxu0 %v1707_v17  ;;  %822 = vmatmul.bf16.gmra.mxu1 %v1715_v18 }
  0xae   : > { %862 = vmatmul.bf16.gmra.mxu2 %v1723_v19  ;;  %902 = vmatmul.bf16.gmra.mxu3 %v1731_v20  ;;  %v415_v19 = vld [vmem:[#allocation7 + $0x118] sm:$0xff] }
  0xaf   : > { %v431_v20 = vld [vmem:[#allocation7 + $0x198] sm:$0xff] }
  0xbd   : > { %787 = vmatmul.bf16.gmra.mxu0 %v1708_v21  ;;  %827 = vmatmul.bf16.gmra.mxu1 %v1716_v22  ;;  %v384_v21 = vld [vmem:[#allocation7 + $0x20] sm:$0xff] }
  0xbe   : > { %867 = vmatmul.bf16.gmra.mxu2 %v1724_v23  ;;  %907 = vmatmul.bf16.gmra.mxu3 %v1732_v24  ;;  %v400_v22 = vld [vmem:[#allocation7 + $0xa0] sm:$0xff] }
  0xcd   : > { %792 = vmatmul.bf16.gmra.mxu0 %v1709_v25  ;;  %832 = vmatmul.bf16.gmra.mxu1 %v1717_v26 }
  0xce   : > { %872 = vmatmul.bf16.gmra.mxu2 %v1725_v27  ;;  %912 = vmatmul.bf16.gmra.mxu3 %v1733_v28 }
  0xdd   : > { %797 = vmatmul.bf16.gmra.mxu0 %v1710_v29  ;;  %837 = vmatmul.bf16.gmra.mxu1 %v1718_v30 }
  0xde   : > { %877 = vmatmul.bf16.gmra.mxu2 %v1726_v31  ;;  %917 = vmatmul.bf16.gmra.mxu3 %v1734_v32  ;;  %v416_v31 = vld [vmem:[#allocation7 + $0x120] sm:$0xff] }
  0xdf   : > { %v432_v32 = vld [vmem:[#allocation7 + $0x1a0] sm:$0xff] }
  0xed   : > { %802 = vmatmul.bf16.gmra.mxu0 %v1711_v33  ;;  %842 = vmatmul.bf16.gmra.mxu1 %v1719_v34  ;;  %v385_v33 = vld [vmem:[#allocation7 + $0x28] sm:$0xff] }
  0xee   : > { %882 = vmatmul.bf16.gmra.mxu2 %v1727_v35  ;;  %922 = vmatmul.bf16.gmra.mxu3 %v1735_v36  ;;  %v401_v34 = vld [vmem:[#allocation7 + $0xa8] sm:$0xff] }
  0xfd   : > { %807 = vmatmul.bf16.gmra.mxu0 %v1712_v37  ;;  %847 = vmatmul.bf16.gmra.mxu1 %v1720_v38 }
  0xfe   : > { %887 = vmatmul.bf16.gmra.mxu2 %v1728_v39  ;;  %927 = vmatmul.bf16.gmra.mxu3 %v1736_v40 }
 0x10a   : > { %v773_v43 = vpop.f32.mrf.mxu0  ;;  %v813_v44 = vpop.f32.mrf.mxu1 }
 0x10b   : > { %v933_v45 = vadd.f32 %v773_v43, %v380_v41  ;;  %v949_v46 = vadd.f32 %v813_v44, %v396_v42  ;;  %v417_v43 = vld [vmem:[#allocation7 + $0x128] sm:$0xff] }
 0x10c   : > { %v433_v44 = vld [vmem:[#allocation7 + $0x1a8] sm:$0xff] }
 0x10d   : > { %997 = vst [vmem:[#allocation7] sm:$0xff] %v933_v45  ;;  %v386_v45 = vld [vmem:[#allocation7 + $0x30] sm:$0xff] }
 0x10e   : > { %1013 = vst [vmem:[#allocation7 + $0x80] sm:$0xff] %v949_v46  ;;  %v402_v46 = vld [vmem:[#allocation7 + $0xb0] sm:$0xff] }
 0x111   : > { %v853_v51 = vpop.f32.mrf.mxu2  ;;  %v893_v52 = vpop.f32.mrf.mxu3 }
 0x112   : > { %v965_v53 = vadd.f32 %v853_v51, %v412_v47  ;;  %v981_v54 = vadd.f32 %v893_v52, %v428_v48  ;;  %v775_v55 = vpop.f32.mrf.mxu0  ;;  %v815_v56 = vpop.f32.mrf.mxu1 }
 0x113   : > { %v934_v57 = vadd.f32 %v775_v55, %v381_v49  ;;  %v950_v58 = vadd.f32 %v815_v56, %v397_v50  ;;  %v418_v55 = vld [vmem:[#allocation7 + $0x130] sm:$0xff] }
 0x114   : > { %1029 = vst [vmem:[#allocation7 + $0x100] sm:$0xff] %v965_v53  ;;  %v434_v56 = vld [vmem:[#allocation7 + $0x1b0] sm:$0xff] }
 0x115   : > { %1045 = vst [vmem:[#allocation7 + $0x180] sm:$0xff] %v981_v54 }
 0x116   : > { %998 = vst [vmem:[#allocation7 + $0x8] sm:$0xff] %v934_v57  ;;  %v387_v57 = vld [vmem:[#allocation7 + $0x38] sm:$0xff] }
 0x117   : > { %1014 = vst [vmem:[#allocation7 + $0x88] sm:$0xff] %v950_v58  ;;  %v403_v58 = vld [vmem:[#allocation7 + $0xb8] sm:$0xff] }
 0x119   : > { %v855_v63 = vpop.f32.mrf.mxu2  ;;  %v895_v0 = vpop.f32.mrf.mxu3 }
 0x11a   : > { %v966_v1 = vadd.f32 %v855_v63, %v413_v59  ;;  %v982_v2 = vadd.f32 %v895_v0, %v429_v60  ;;  %v778_v3 = vpop.f32.mrf.mxu0  ;;  %v818_v4 = vpop.f32.mrf.mxu1 }
 0x11b   : > { %v935_v5 = vadd.f32 %v778_v3, %v382_v61  ;;  %v951_v6 = vadd.f32 %v818_v4, %v398_v62  ;;  %v419_v3 = vld [vmem:[#allocation7 + $0x138] sm:$0xff] }
 0x11c   : > { %1030 = vst [vmem:[#allocation7 + $0x108] sm:$0xff] %v966_v1  ;;  %v435_v4 = vld [vmem:[#allocation7 + $0x1b8] sm:$0xff] }
 0x11d   : > { %1046 = vst [vmem:[#allocation7 + $0x188] sm:$0xff] %v982_v2 }
 0x11e   : > { %999 = vst [vmem:[#allocation7 + $0x10] sm:$0xff] %v935_v5  ;;  %v388_v5 = vld [vmem:[#allocation7 + $0x40] sm:$0xff] }
 0x11f   : > { %1015 = vst [vmem:[#allocation7 + $0x90] sm:$0xff] %v951_v6  ;;  %v404_v6 = vld [vmem:[#allocation7 + $0xc0] sm:$0xff] }
 0x121   : > { %v858_v11 = vpop.f32.mrf.mxu2  ;;  %v898_v12 = vpop.f32.mrf.mxu3 }
 0x122   : > { %v967_v13 = vadd.f32 %v858_v11, %v414_v7  ;;  %v983_v14 = vadd.f32 %v898_v12, %v430_v8  ;;  %v780_v15 = vpop.f32.mrf.mxu0  ;;  %v820_v16 = vpop.f32.mrf.mxu1 }
 0x123   : > { %v936_v17 = vadd.f32 %v780_v15, %v383_v9  ;;  %v952_v18 = vadd.f32 %v820_v16, %v399_v10  ;;  %v420_v15 = vld [vmem:[#allocation7 + $0x140] sm:$0xff] }
 0x124   : > { %1031 = vst [vmem:[#allocation7 + $0x110] sm:$0xff] %v967_v13  ;;  %v436_v16 = vld [vmem:[#allocation7 + $0x1c0] sm:$0xff] }
 0x125   : > { %1047 = vst [vmem:[#allocation7 + $0x190] sm:$0xff] %v983_v14 }
 0x126   : > { %1000 = vst [vmem:[#allocation7 + $0x18] sm:$0xff] %v936_v17  ;;  %v389_v17 = vld [vmem:[#allocation7 + $0x48] sm:$0xff] }
 0x127   : > { %1016 = vst [vmem:[#allocation7 + $0x98] sm:$0xff] %v952_v18  ;;  %v405_v18 = vld [vmem:[#allocation7 + $0xc8] sm:$0xff] }
 0x129   : > { %v860_v23 = vpop.f32.mrf.mxu2  ;;  %v900_v24 = vpop.f32.mrf.mxu3 }
 0x12a   : > { %v968_v25 = vadd.f32 %v860_v23, %v415_v19  ;;  %v984_v26 = vadd.f32 %v900_v24, %v431_v20  ;;  %v783_v27 = vpop.f32.mrf.mxu0  ;;  %v823_v28 = vpop.f32.mrf.mxu1 }
 0x12b   : > { %v937_v29 = vadd.f32 %v783_v27, %v384_v21  ;;  %v953_v30 = vadd.f32 %v823_v28, %v400_v22  ;;  %v421_v27 = vld [vmem:[#allocation7 + $0x148] sm:$0xff] }
 0x12c   : > { %1032 = vst [vmem:[#allocation7 + $0x118] sm:$0xff] %v968_v25  ;;  %v437_v28 = vld [vmem:[#allocation7 + $0x1c8] sm:$0xff] }
 0x12d   : > { %1048 = vst [vmem:[#allocation7 + $0x198] sm:$0xff] %v984_v26 }
 0x12e   : > { %1001 = vst [vmem:[#allocation7 + $0x20] sm:$0xff] %v937_v29  ;;  %v390_v29 = vld [vmem:[#allocation7 + $0x50] sm:$0xff] }
 0x12f   : > { %1017 = vst [vmem:[#allocation7 + $0xa0] sm:$0xff] %v953_v30  ;;  %v406_v30 = vld [vmem:[#allocation7 + $0xd0] sm:$0xff] }
 0x131   : > { %v863_v35 = vpop.f32.mrf.mxu2  ;;  %v903_v36 = vpop.f32.mrf.mxu3 }
 0x132   : > { %v969_v37 = vadd.f32 %v863_v35, %v416_v31  ;;  %v985_v38 = vadd.f32 %v903_v36, %v432_v32  ;;  %v785_v39 = vpop.f32.mrf.mxu0  ;;  %v825_v40 = vpop.f32.mrf.mxu1 }
 0x133   : > { %v938_v41 = vadd.f32 %v785_v39, %v385_v33  ;;  %v954_v42 = vadd.f32 %v825_v40, %v401_v34  ;;  %v422_v39 = vld [vmem:[#allocation7 + $0x150] sm:$0xff] }
 0x134   : > { %1033 = vst [vmem:[#allocation7 + $0x120] sm:$0xff] %v969_v37  ;;  %v438_v40 = vld [vmem:[#allocation7 + $0x1d0] sm:$0xff] }
 0x135   : > { %1049 = vst [vmem:[#allocation7 + $0x1a0] sm:$0xff] %v985_v38 }
 0x136   : > { %1002 = vst [vmem:[#allocation7 + $0x28] sm:$0xff] %v938_v41  ;;  %v391_v41 = vld [vmem:[#allocation7 + $0x58] sm:$0xff] }
 0x137   : > { %1018 = vst [vmem:[#allocation7 + $0xa8] sm:$0xff] %v954_v42  ;;  %v407_v42 = vld [vmem:[#allocation7 + $0xd8] sm:$0xff] }
 0x139   : > { %v865_v47 = vpop.f32.mrf.mxu2  ;;  %v905_v48 = vpop.f32.mrf.mxu3 }
 0x13a   : > { %v970_v49 = vadd.f32 %v865_v47, %v417_v43  ;;  %v986_v50 = vadd.f32 %v905_v48, %v433_v44  ;;  %v788_v51 = vpop.f32.mrf.mxu0  ;;  %v828_v52 = vpop.f32.mrf.mxu1 }
 0x13b   : > { %v939_v53 = vadd.f32 %v788_v51, %v386_v45  ;;  %v955_v54 = vadd.f32 %v828_v52, %v402_v46  ;;  %v423_v51 = vld [vmem:[#allocation7 + $0x158] sm:$0xff] }
 0x13c   : > { %1034 = vst [vmem:[#allocation7 + $0x128] sm:$0xff] %v970_v49  ;;  %v439_v52 = vld [vmem:[#allocation7 + $0x1d8] sm:$0xff] }
 0x13d   : > { %1050 = vst [vmem:[#allocation7 + $0x1a8] sm:$0xff] %v986_v50 }
 0x13e   : > { %1003 = vst [vmem:[#allocation7 + $0x30] sm:$0xff] %v939_v53  ;;  %v392_v53 = vld [vmem:[#allocation7 + $0x60] sm:$0xff] }
 0x13f   : > { %1019 = vst [vmem:[#allocation7 + $0xb0] sm:$0xff] %v955_v54  ;;  %v408_v54 = vld [vmem:[#allocation7 + $0xe0] sm:$0xff] }
 0x141   : > { %v868_v59 = vpop.f32.mrf.mxu2  ;;  %v908_v60 = vpop.f32.mrf.mxu3 }
 0x142   : > { %v971_v61 = vadd.f32 %v868_v59, %v418_v55  ;;  %v987_v62 = vadd.f32 %v908_v60, %v434_v56  ;;  %v790_v63 = vpop.f32.mrf.mxu0  ;;  %v830_v0 = vpop.f32.mrf.mxu1 }
 0x143   : > { %v940_v1 = vadd.f32 %v790_v63, %v387_v57  ;;  %v956_v2 = vadd.f32 %v830_v0, %v403_v58  ;;  %v424_v63 = vld [vmem:[#allocation7 + $0x160] sm:$0xff] }
 0x144   : > { %1035 = vst [vmem:[#allocation7 + $0x130] sm:$0xff] %v971_v61  ;;  %v440_v0 = vld [vmem:[#allocation7 + $0x1e0] sm:$0xff] }
 0x145   : > { %1051 = vst [vmem:[#allocation7 + $0x1b0] sm:$0xff] %v987_v62 }
 0x146   : > { %1004 = vst [vmem:[#allocation7 + $0x38] sm:$0xff] %v940_v1  ;;  %v393_v1 = vld [vmem:[#allocation7 + $0x68] sm:$0xff] }
 0x147   : > { %1020 = vst [vmem:[#allocation7 + $0xb8] sm:$0xff] %v956_v2  ;;  %v409_v2 = vld [vmem:[#allocation7 + $0xe8] sm:$0xff] }
 0x149   : > { %v870_v7 = vpop.f32.mrf.mxu2  ;;  %v910_v8 = vpop.f32.mrf.mxu3 }
 0x14a   : > { %v972_v9 = vadd.f32 %v870_v7, %v419_v3  ;;  %v988_v10 = vadd.f32 %v910_v8, %v435_v4  ;;  %v793_v11 = vpop.f32.mrf.mxu0  ;;  %v833_v12 = vpop.f32.mrf.mxu1 }
 0x14b   : > { %v941_v13 = vadd.f32 %v793_v11, %v388_v5  ;;  %v957_v14 = vadd.f32 %v833_v12, %v404_v6  ;;  %v425_v11 = vld [vmem:[#allocation7 + $0x168] sm:$0xff] }
 0x14c   : > { %1036 = vst [vmem:[#allocation7 + $0x138] sm:$0xff] %v972_v9  ;;  %v441_v12 = vld [vmem:[#allocation7 + $0x1e8] sm:$0xff] }
 0x14d   : > { %1052 = vst [vmem:[#allocation7 + $0x1b8] sm:$0xff] %v988_v10 }
 0x14e   : > { %1005 = vst [vmem:[#allocation7 + $0x40] sm:$0xff] %v941_v13  ;;  %v394_v13 = vld [vmem:[#allocation7 + $0x70] sm:$0xff] }
 0x14f   : > { %1021 = vst [vmem:[#allocation7 + $0xc0] sm:$0xff] %v957_v14  ;;  %v410_v14 = vld [vmem:[#allocation7 + $0xf0] sm:$0xff] }
 0x151   : > { %v873_v19 = vpop.f32.mrf.mxu2  ;;  %v913_v20 = vpop.f32.mrf.mxu3 }
 0x152   : > { %v973_v21 = vadd.f32 %v873_v19, %v420_v15  ;;  %v989_v22 = vadd.f32 %v913_v20, %v436_v16  ;;  %v795_v23 = vpop.f32.mrf.mxu0  ;;  %v835_v24 = vpop.f32.mrf.mxu1 }
 0x153   : > { %v942_v25 = vadd.f32 %v795_v23, %v389_v17  ;;  %v958_v26 = vadd.f32 %v835_v24, %v405_v18  ;;  %v426_v23 = vld [vmem:[#allocation7 + $0x170] sm:$0xff] }
 0x154   : > { %1037 = vst [vmem:[#allocation7 + $0x140] sm:$0xff] %v973_v21  ;;  %v442_v24 = vld [vmem:[#allocation7 + $0x1f0] sm:$0xff] }
 0x155   : > { %1053 = vst [vmem:[#allocation7 + $0x1c0] sm:$0xff] %v989_v22 }
 0x156   : > { %1006 = vst [vmem:[#allocation7 + $0x48] sm:$0xff] %v942_v25  ;;  %v395_v25 = vld [vmem:[#allocation7 + $0x78] sm:$0xff] }
 0x157   : > { %1022 = vst [vmem:[#allocation7 + $0xc8] sm:$0xff] %v958_v26  ;;  %v411_v26 = vld [vmem:[#allocation7 + $0xf8] sm:$0xff] }
 0x159   : > { %v875_v31 = vpop.f32.mrf.mxu2  ;;  %v915_v32 = vpop.f32.mrf.mxu3 }
 0x15a   : > { %v974_v33 = vadd.f32 %v875_v31, %v421_v27  ;;  %v990_v34 = vadd.f32 %v915_v32, %v437_v28  ;;  %v798_v35 = vpop.f32.mrf.mxu0  ;;  %v838_v36 = vpop.f32.mrf.mxu1 }
 0x15b   : > { %v943_v37 = vadd.f32 %v798_v35, %v390_v29  ;;  %v959_v38 = vadd.f32 %v838_v36, %v406_v30  ;;  %v427_v35 = vld [vmem:[#allocation7 + $0x178] sm:$0xff] }
 0x15c   : > { %1038 = vst [vmem:[#allocation7 + $0x148] sm:$0xff] %v974_v33  ;;  %v443_v36 = vld [vmem:[#allocation7 + $0x1f8] sm:$0xff] }
 0x15d   : > { %1054 = vst [vmem:[#allocation7 + $0x1c8] sm:$0xff] %v990_v34 }
 0x15e   : > { %1007 = vst [vmem:[#allocation7 + $0x50] sm:$0xff] %v943_v37 }
 0x15f   : > { %1023 = vst [vmem:[#allocation7 + $0xd0] sm:$0xff] %v959_v38 }
 0x161   : > { %v878_v43 = vpop.f32.mrf.mxu2  ;;  %v918_v44 = vpop.f32.mrf.mxu3 }
 0x162   : > { %v975_v45 = vadd.f32 %v878_v43, %v422_v39  ;;  %v991_v46 = vadd.f32 %v918_v44, %v438_v40  ;;  %v800_v47 = vpop.f32.mrf.mxu0  ;;  %v840_v48 = vpop.f32.mrf.mxu1 }
 0x163   : > { %v944_v49 = vadd.f32 %v800_v47, %v391_v41  ;;  %v960_v50 = vadd.f32 %v840_v48, %v407_v42 }
 0x164   : > { %1039 = vst [vmem:[#allocation7 + $0x150] sm:$0xff] %v975_v45 }
 0x165   : > { %1055 = vst [vmem:[#allocation7 + $0x1d0] sm:$0xff] %v991_v46 }
 0x166   : > { %1008 = vst [vmem:[#allocation7 + $0x58] sm:$0xff] %v944_v49 }
 0x167   : > { %1024 = vst [vmem:[#allocation7 + $0xd8] sm:$0xff] %v960_v50 }
 0x169   : > { %v880_v55 = vpop.f32.mrf.mxu2  ;;  %v920_v56 = vpop.f32.mrf.mxu3 }
 0x16a   : > { %v976_v57 = vadd.f32 %v880_v55, %v423_v51  ;;  %v992_v58 = vadd.f32 %v920_v56, %v439_v52  ;;  %v803_v59 = vpop.f32.mrf.mxu0  ;;  %v843_v60 = vpop.f32.mrf.mxu1 }
 0x16b   : > { %v945_v61 = vadd.f32 %v803_v59, %v392_v53  ;;  %v961_v62 = vadd.f32 %v843_v60, %v408_v54 }
 0x16c   : > { %1040 = vst [vmem:[#allocation7 + $0x158] sm:$0xff] %v976_v57 }
 0x16d   : > { %1056 = vst [vmem:[#allocation7 + $0x1d8] sm:$0xff] %v992_v58 }
 0x16e   : > { %1009 = vst [vmem:[#allocation7 + $0x60] sm:$0xff] %v945_v61 }
 0x16f   : > { %1025 = vst [vmem:[#allocation7 + $0xe0] sm:$0xff] %v961_v62 }
 0x171   : > { %v883_v3 = vpop.f32.mrf.mxu2  ;;  %v923_v4 = vpop.f32.mrf.mxu3 }
 0x172   : > { %v977_v5 = vadd.f32 %v883_v3, %v424_v63  ;;  %v993_v6 = vadd.f32 %v923_v4, %v440_v0  ;;  %v805_v7 = vpop.f32.mrf.mxu0  ;;  %v845_v8 = vpop.f32.mrf.mxu1 }
 0x173   : > { %v946_v9 = vadd.f32 %v805_v7, %v393_v1  ;;  %v962_v10 = vadd.f32 %v845_v8, %v409_v2 }
 0x174   : > { %1041 = vst [vmem:[#allocation7 + $0x160] sm:$0xff] %v977_v5 }
 0x175   : > { %1057 = vst [vmem:[#allocation7 + $0x1e0] sm:$0xff] %v993_v6 }
 0x176   : > { %1010 = vst [vmem:[#allocation7 + $0x68] sm:$0xff] %v946_v9 }
 0x177   : > { %1026 = vst [vmem:[#allocation7 + $0xe8] sm:$0xff] %v962_v10 }
 0x179   : > { %v885_v15 = vpop.f32.mrf.mxu2  ;;  %v925_v16 = vpop.f32.mrf.mxu3 }
 0x17a   : > { %v978_v17 = vadd.f32 %v885_v15, %v425_v11  ;;  %v994_v18 = vadd.f32 %v925_v16, %v441_v12  ;;  %v808_v19 = vpop.f32.mrf.mxu0  ;;  %v848_v20 = vpop.f32.mrf.mxu1 }
 0x17b   : > { %v947_v21 = vadd.f32 %v808_v19, %v394_v13  ;;  %v963_v22 = vadd.f32 %v848_v20, %v410_v14 }
 0x17c   : > { %1042 = vst [vmem:[#allocation7 + $0x168] sm:$0xff] %v978_v17 }
 0x17d   : > { %1058 = vst [vmem:[#allocation7 + $0x1e8] sm:$0xff] %v994_v18 }
 0x17e   : > { %1011 = vst [vmem:[#allocation7 + $0x70] sm:$0xff] %v947_v21 }
 0x17f   : > { %1027 = vst [vmem:[#allocation7 + $0xf0] sm:$0xff] %v963_v22 }
 0x181   : > { %v888_v27 = vpop.f32.mrf.mxu2  ;;  %v928_v28 = vpop.f32.mrf.mxu3 }
 0x182   : > { %v979_v29 = vadd.f32 %v888_v27, %v426_v23  ;;  %v995_v30 = vadd.f32 %v928_v28, %v442_v24  ;;  %v810_v31 = vpop.f32.mrf.mxu0  ;;  %v850_v32 = vpop.f32.mrf.mxu1 }
 0x183   : > { %v948_v33 = vadd.f32 %v810_v31, %v395_v25  ;;  %v964_v34 = vadd.f32 %v850_v32, %v411_v26 }
 0x184   : > { %1043 = vst [vmem:[#allocation7 + $0x170] sm:$0xff] %v979_v29 }
 0x185   : > { %1059 = vst [vmem:[#allocation7 + $0x1f0] sm:$0xff] %v995_v30 }
 0x186   : > { %1012 = vst [vmem:[#allocation7 + $0x78] sm:$0xff] %v948_v33 }
 0x187   : > { %1028 = vst [vmem:[#allocation7 + $0xf8] sm:$0xff] %v964_v34 }
 0x189   : > { %v890_v37 = vpop.f32.mrf.mxu2  ;;  %v930_v38 = vpop.f32.mrf.mxu3  ;;  %1064 = sbr.rel (%p1699_p0) target bundleno = 470 (0x1d6), region = 52 }
 0x18a   : > { %v980_v39 = vadd.f32 %v890_v37, %v427_v35  ;;  %v996_v40 = vadd.f32 %v930_v38, %v443_v36 }
 0x18c   : > { %1044 = vst [vmem:[#allocation7 + $0x178] sm:$0xff] %v980_v39 }
 0x18d   : > { %1060 = vst [vmem:[#allocation7 + $0x1f8] sm:$0xff] %v996_v40 }
 0x18e   : > { %v1065_v41 = vld [vmem:[#allocation7] sm:$0xff]  ;;  %v1066_v44 = vld [vmem:[#allocation7 + $0x8] sm:$0xff]  ;;  %v1067_v47 = vld [vmem:[#allocation7 + $0x10] sm:$0xff] }
 0x18f   : > { %v2226_v42 = vld [vmem:[%s2389_s2] ss:$0 sm:$0xff]  ;;  %v1068_v48 = vld [vmem:[#allocation7 + $0x18] sm:$0xff]  ;;  %v1070_v53 = vld [vmem:[#allocation7 + $0x28] sm:$0xff] }
 0x190   : > { %v2231_v43 = vld [vmem:[%s2390_s3] ss:$0 sm:$0xff]  ;;  %v1133_v45 = vmul.f32 %v2226_v42, %v1065_v41  ;;  %v1134_v46 = vmul.f32 %v2226_v42, %v1066_v44  ;;  %v1135_v50 = vmul.f32 %v2226_v42, %v1067_v47  ;;  %v1136_v51 = vmul.f32 %v2226_v42, %v1068_v48  ;;  %v1071_v54 = vld [vmem:[#allocation7 + $0x30] sm:$0xff]  ;;  %v1072_v55 = vld [vmem:[#allocation7 + $0x38] sm:$0xff] }
 0x191   : > { %v1069_v49 = vld [vmem:[#allocation7 + $0x20] sm:$0xff]  ;;  %v1138_v58 = vmul.f32 %v2226_v42, %v1070_v53  ;;  %v1139_v59 = vmul.f32 %v2226_v42, %v1071_v54  ;;  %v1140_v63 = vmul.f32 %v2226_v42, %v1072_v55  ;;  %v1074_v1 = vld [vmem:[#allocation7 + $0x48] sm:$0xff]  ;;  %v1075_v6 = vld [vmem:[#allocation7 + $0x50] sm:$0xff] }
 0x192   : > { %v1137_v52 = vmul.f32 %v2226_v42, %v1069_v49  ;;  %v1201_v56 = vadd.f32 %v2231_v43, %v1133_v45  ;;  %v1202_v57 = vadd.f32 %v2231_v43, %v1134_v46  ;;  %v1203_v60 = vadd.f32 %v2231_v43, %v1135_v50  ;;  %v1073_v0 = vld [vmem:[#allocation7 + $0x40] sm:$0xff]  ;;  %v1076_v7 = vld [vmem:[#allocation7 + $0x58] sm:$0xff]  ;;  %v1078_v12 = vld [vmem:[#allocation7 + $0x68] sm:$0xff] }
 0x193   : > { %v1204_v61 = vadd.f32 %v2231_v43, %v1136_v51  ;;  %v1206_v4 = vadd.f32 %v2231_v43, %v1138_v58  ;;  %v1207_v5 = vadd.f32 %v2231_v43, %v1139_v59  ;;  %v1077_v8 = vld [vmem:[#allocation7 + $0x60] sm:$0xff]  ;;  %v1208_v11 = vadd.f32 %v2231_v43, %v1140_v63  ;;  %v1079_v13 = vld [vmem:[#allocation7 + $0x70] sm:$0xff]  ;;  %v1080_v18 = vld [vmem:[#allocation7 + $0x78] sm:$0xff] }
 0x194   : > { %v1205_v62 = vadd.f32 %v2231_v43, %v1137_v52  ;;  %v1265_v2 = vmax.f32 %v1201_v56, 0.0  ;;  %v1266_v3 = vmax.f32 %v1202_v57, 0.0  ;;  %v1267_v9 = vmax.f32 %v1203_v60, 0.0  ;;  %v1081_v31 = vld [vmem:[#allocation7 + $0x80] sm:$0xff]  ;;  %v1082_v32 = vld [vmem:[#allocation7 + $0x88] sm:$0xff]  ;;  %v1083_v35 = vld [vmem:[#allocation7 + $0x90] sm:$0xff] }
 0x195   : > { %v1268_v10 = vmax.f32 %v1204_v61, 0.0  ;;  %v1270_v15 = vmax.f32 %v1206_v4, 0.0  ;;  %v1141_v16 = vmul.f32 %v2226_v42, %v1073_v0  ;;  %v1142_v17 = vmul.f32 %v2226_v42, %v1074_v1  ;;  %v1084_v36 = vld [vmem:[#allocation7 + $0x98] sm:$0xff]  ;;  %v1085_v39 = vld [vmem:[#allocation7 + $0xa0] sm:$0xff]  ;;  %v1086_v46 = vld [vmem:[#allocation7 + $0xa8] sm:$0xff] }
 0x196   : > { %1329 = vst [vmem:[#allocation7] sm:$0xff] %v1265_v2  ;;  %v1269_v14 = vmax.f32 %v1205_v62, 0.0  ;;  %v1271_v19 = vmax.f32 %v1207_v5, 0.0  ;;  %v1143_v20 = vmul.f32 %v2226_v42, %v1075_v6  ;;  %v1144_v21 = vmul.f32 %v2226_v42, %v1076_v7  ;;  %v1087_v51 = vld [vmem:[#allocation7 + $0xb0] sm:$0xff]  ;;  %v1088_v55 = vld [vmem:[#allocation7 + $0xb8] sm:$0xff]  ;;  %v1089_v59 = vld [vmem:[#allocation7 + $0xc0] sm:$0xff] }
 0x197   : > { %1330 = vst [vmem:[#allocation7 + $0x8] sm:$0xff] %v1266_v3  ;;  %v1145_v22 = vmul.f32 %v2226_v42, %v1077_v8  ;;  %v1209_v23 = vadd.f32 %v2231_v43, %v1141_v16  ;;  %v1210_v24 = vadd.f32 %v2231_v43, %v1142_v17  ;;  %v1146_v25 = vmul.f32 %v2226_v42, %v1078_v12  ;;  %v1090_v63 = vld [vmem:[#allocation7 + $0xc8] sm:$0xff]  ;;  %v1091_v3 = vld [vmem:[#allocation7 + $0xd0] sm:$0xff]  ;;  %v1092_v7 = vld [vmem:[#allocation7 + $0xd8] sm:$0xff] }
 0x198   : > { %1331 = vst [vmem:[#allocation7 + $0x10] sm:$0xff] %v1267_v9  ;;  %v1147_v26 = vmul.f32 %v2226_v42, %v1079_v13  ;;  %v1272_v27 = vmax.f32 %v1208_v11, 0.0  ;;  %v1211_v28 = vadd.f32 %v2231_v43, %v1143_v20  ;;  %v1212_v29 = vadd.f32 %v2231_v43, %v1144_v21  ;;  %v1093_v11 = vld [vmem:[#allocation7 + $0xe0] sm:$0xff] }
 0x199   : > { %1332 = vst [vmem:[#allocation7 + $0x18] sm:$0xff] %v1268_v10  ;;  %v1148_v30 = vmul.f32 %v2226_v42, %v1080_v18  ;;  %v1273_v33 = vmax.f32 %v1209_v23, 0.0  ;;  %v1213_v34 = vadd.f32 %v2231_v43, %v1145_v22  ;;  %v1274_v37 = vmax.f32 %v1210_v24, 0.0  ;;  %v1096_v23 = vld [vmem:[#allocation7 + $0xf8] sm:$0xff] }
 0x19a   : > { %1333 = vst [vmem:[#allocation7 + $0x20] sm:$0xff] %v1269_v14  ;;  %v1214_v38 = vadd.f32 %v2231_v43, %v1146_v25  ;;  %v1275_v40 = vmax.f32 %v1211_v28, 0.0  ;;  %v1215_v41 = vadd.f32 %v2231_v43, %v1147_v26  ;;  %v1149_v44 = vmul.f32 %v2226_v42, %v1081_v31  ;;  %v1098_v31 = vld [vmem:[#allocation7 + $0x108] sm:$0xff] }
 0x19b   : > { %1334 = vst [vmem:[#allocation7 + $0x28] sm:$0xff] %v1270_v15  ;;  %v1150_v45 = vmul.f32 %v2226_v42, %v1082_v32  ;;  %v1276_v47 = vmax.f32 %v1212_v29, 0.0  ;;  %v1216_v48 = vadd.f32 %v2231_v43, %v1148_v30  ;;  %v1151_v49 = vmul.f32 %v2226_v42, %v1083_v35  ;;  %v1094_v15 = vld [vmem:[#allocation7 + $0xe8] sm:$0xff]  ;;  %v1099_v35 = vld [vmem:[#allocation7 + $0x110] sm:$0xff] }
 0x19c   : > { %1335 = vst [vmem:[#allocation7 + $0x30] sm:$0xff] %v1271_v19  ;;  %v1152_v50 = vmul.f32 %v2226_v42, %v1084_v36  ;;  %v1277_v52 = vmax.f32 %v1213_v34, 0.0  ;;  %v1217_v53 = vadd.f32 %v2231_v43, %v1149_v44  ;;  %v1153_v54 = vmul.f32 %v2226_v42, %v1085_v39  ;;  %v1095_v19 = vld [vmem:[#allocation7 + $0xf0] sm:$0xff]  ;;  %v1100_v39 = vld [vmem:[#allocation7 + $0x118] sm:$0xff] }
 0x19d   : > { %1336 = vst [vmem:[#allocation7 + $0x38] sm:$0xff] %v1272_v27  ;;  %v1278_v56 = vmax.f32 %v1214_v38, 0.0  ;;  %v1218_v57 = vadd.f32 %v2231_v43, %v1150_v45  ;;  %v1154_v58 = vmul.f32 %v2226_v42, %v1086_v46  ;;  %v1279_v60 = vmax.f32 %v1215_v41, 0.0  ;;  %v1097_v27 = vld [vmem:[#allocation7 + $0x100] sm:$0xff] }
 0x19e   : > { %1337 = vst [vmem:[#allocation7 + $0x40] sm:$0xff] %v1273_v33  ;;  %v1219_v61 = vadd.f32 %v2231_v43, %v1151_v49  ;;  %v1155_v62 = vmul.f32 %v2226_v42, %v1087_v51  ;;  %v1280_v0 = vmax.f32 %v1216_v48, 0.0  ;;  %v1220_v1 = vadd.f32 %v2231_v43, %v1152_v50  ;;  %v1101_v45 = vld [vmem:[#allocation7 + $0x120] sm:$0xff]  ;;  %v1102_v49 = vld [vmem:[#allocation7 + $0x128] sm:$0xff] }
 0x19f   : > { %1338 = vst [vmem:[#allocation7 + $0x48] sm:$0xff] %v1274_v37  ;;  %v1156_v2 = vmul.f32 %v2226_v42, %v1088_v55  ;;  %v1281_v4 = vmax.f32 %v1217_v53, 0.0  ;;  %v1221_v5 = vadd.f32 %v2231_v43, %v1153_v54  ;;  %v1157_v6 = vmul.f32 %v2226_v42, %v1089_v59  ;;  %v1103_v53 = vld [vmem:[#allocation7 + $0x130] sm:$0xff] }
 0x1a0   : > { %1339 = vst [vmem:[#allocation7 + $0x50] sm:$0xff] %v1275_v40  ;;  %v1282_v8 = vmax.f32 %v1218_v57, 0.0  ;;  %v1222_v9 = vadd.f32 %v2231_v43, %v1154_v58  ;;  %v1158_v10 = vmul.f32 %v2226_v42, %v1090_v63  ;;  %v1283_v12 = vmax.f32 %v1219_v61, 0.0  ;;  %v1104_v57 = vld [vmem:[#allocation7 + $0x138] sm:$0xff]  ;;  %v1105_v61 = vld [vmem:[#allocation7 + $0x140] sm:$0xff] }
 0x1a1   : > { %1340 = vst [vmem:[#allocation7 + $0x58] sm:$0xff] %v1276_v47  ;;  %v1223_v13 = vadd.f32 %v2231_v43, %v1155_v62  ;;  %v1159_v14 = vmul.f32 %v2226_v42, %v1091_v3  ;;  %v1284_v16 = vmax.f32 %v1220_v1, 0.0  ;;  %v1224_v17 = vadd.f32 %v2231_v43, %v1156_v2  ;;  %v1106_v1 = vld [vmem:[#allocation7 + $0x148] sm:$0xff] }
 0x1a2   : > { %1341 = vst [vmem:[#allocation7 + $0x60] sm:$0xff] %v1277_v52  ;;  %v1160_v18 = vmul.f32 %v2226_v42, %v1092_v7  ;;  %v1285_v20 = vmax.f32 %v1221_v5, 0.0  ;;  %v1225_v21 = vadd.f32 %v2231_v43, %v1157_v6  ;;  %v1161_v22 = vmul.f32 %v2226_v42, %v1093_v11  ;;  %v1107_v5 = vld [vmem:[#allocation7 + $0x150] sm:$0xff] }
 0x1a3   : > { %1342 = vst [vmem:[#allocation7 + $0x68] sm:$0xff] %v1278_v56  ;;  %v1286_v24 = vmax.f32 %v1222_v9, 0.0  ;;  %v1226_v25 = vadd.f32 %v2231_v43, %v1158_v10  ;;  %v1162_v26 = vmul.f32 %v2226_v42, %v1094_v15  ;;  %v1287_v28 = vmax.f32 %v1223_v13, 0.0  ;;  %v1108_v9 = vld [vmem:[#allocation7 + $0x158] sm:$0xff]  ;;  %v1109_v13 = vld [vmem:[#allocation7 + $0x160] sm:$0xff] }
 0x1a4   : > { %1343 = vst [vmem:[#allocation7 + $0x70] sm:$0xff] %v1279_v60  ;;  %v1227_v29 = vadd.f32 %v2231_v43, %v1159_v14  ;;  %v1163_v30 = vmul.f32 %v2226_v42, %v1095_v19  ;;  %v1288_v32 = vmax.f32 %v1224_v17, 0.0  ;;  %v1228_v33 = vadd.f32 %v2231_v43, %v1160_v18  ;;  %v1110_v17 = vld [vmem:[#allocation7 + $0x168] sm:$0xff] }
 0x1a5   : > { %1344 = vst [vmem:[#allocation7 + $0x78] sm:$0xff] %v1280_v0  ;;  %v1164_v34 = vmul.f32 %v2226_v42, %v1096_v23  ;;  %v1289_v36 = vmax.f32 %v1225_v21, 0.0  ;;  %v1229_v37 = vadd.f32 %v2231_v43, %v1161_v22  ;;  %v1165_v38 = vmul.f32 %v2226_v42, %v1097_v27  ;;  %v1111_v21 = vld [vmem:[#allocation7 + $0x170] sm:$0xff] }
 0x1a6   : > { %1345 = vst [vmem:[#allocation7 + $0x80] sm:$0xff] %v1281_v4  ;;  %v1290_v40 = vmax.f32 %v1226_v25, 0.0  ;;  %v1230_v41 = vadd.f32 %v2231_v43, %v1162_v26  ;;  %v1166_v44 = vmul.f32 %v2226_v42, %v1098_v31  ;;  %v1291_v46 = vmax.f32 %v1227_v29, 0.0  ;;  %v1112_v25 = vld [vmem:[#allocation7 + $0x178] sm:$0xff]  ;;  %v1113_v29 = vld [vmem:[#allocation7 + $0x180] sm:$0xff] }
 0x1a7   : > { %1346 = vst [vmem:[#allocation7 + $0x88] sm:$0xff] %v1282_v8  ;;  %v1231_v47 = vadd.f32 %v2231_v43, %v1163_v30  ;;  %v1167_v48 = vmul.f32 %v2226_v42, %v1099_v35  ;;  %v1292_v50 = vmax.f32 %v1228_v33, 0.0  ;;  %v1232_v51 = vadd.f32 %v2231_v43, %v1164_v34  ;;  %v1114_v33 = vld [vmem:[#allocation7 + $0x188] sm:$0xff] }
 0x1a8   : > { %1347 = vst [vmem:[#allocation7 + $0x90] sm:$0xff] %v1283_v12  ;;  %v1168_v52 = vmul.f32 %v2226_v42, %v1100_v39  ;;  %v1293_v54 = vmax.f32 %v1229_v37, 0.0  ;;  %v1233_v55 = vadd.f32 %v2231_v43, %v1165_v38  ;;  %v1169_v56 = vmul.f32 %v2226_v42, %v1101_v45  ;;  %v1115_v37 = vld [vmem:[#allocation7 + $0x190] sm:$0xff] }
 0x1a9   : > { %1348 = vst [vmem:[#allocation7 + $0x98] sm:$0xff] %v1284_v16  ;;  %v1294_v58 = vmax.f32 %v1230_v41, 0.0  ;;  %v1234_v59 = vadd.f32 %v2231_v43, %v1166_v44  ;;  %v1170_v60 = vmul.f32 %v2226_v42, %v1102_v49  ;;  %v1295_v62 = vmax.f32 %v1231_v47, 0.0  ;;  %v1116_v41 = vld [vmem:[#allocation7 + $0x198] sm:$0xff] }
 0x1aa   : > { %1349 = vst [vmem:[#allocation7 + $0xa0] sm:$0xff] %v1285_v20  ;;  %v1235_v63 = vadd.f32 %v2231_v43, %v1167_v48  ;;  %v1171_v0 = vmul.f32 %v2226_v42, %v1103_v53  ;;  %v1296_v2 = vmax.f32 %v1232_v51, 0.0  ;;  %v1236_v3 = vadd.f32 %v2231_v43, %v1168_v52  ;;  %v1128_v44 = vld [vmem:[#allocation7 + $0x1f8] sm:$0xff]  ;;  %v1117_v48 = vld [vmem:[#allocation7 + $0x1a0] sm:$0xff]  ;;  %v1118_v52 = vld [vmem:[#allocation7 + $0x1a8] sm:$0xff] }
 0x1ab   : > { %1350 = vst [vmem:[#allocation7 + $0xa8] sm:$0xff] %v1286_v24  ;;  %v1172_v4 = vmul.f32 %v2226_v42, %v1104_v57  ;;  %v1297_v6 = vmax.f32 %v1233_v55, 0.0  ;;  %v1237_v7 = vadd.f32 %v2231_v43, %v1169_v56  ;;  %v1173_v8 = vmul.f32 %v2226_v42, %v1105_v61  ;;  %v1119_v56 = vld [vmem:[#allocation7 + $0x1b0] sm:$0xff]  ;;  %v1120_v61 = vld [vmem:[#allocation7 + $0x1b8] sm:$0xff] }
 0x1ac   : > { %1351 = vst [vmem:[#allocation7 + $0xb0] sm:$0xff] %v1287_v28  ;;  %v1298_v10 = vmax.f32 %v1234_v59, 0.0  ;;  %v1238_v11 = vadd.f32 %v2231_v43, %v1170_v60  ;;  %v1174_v12 = vmul.f32 %v2226_v42, %v1106_v1  ;;  %v1299_v14 = vmax.f32 %v1235_v63, 0.0  ;;  %v1121_v1 = vld [vmem:[#allocation7 + $0x1c0] sm:$0xff] }
 0x1ad   : > { %1352 = vst [vmem:[#allocation7 + $0xb8] sm:$0xff] %v1288_v32  ;;  %v1239_v15 = vadd.f32 %v2231_v43, %v1171_v0  ;;  %v1175_v16 = vmul.f32 %v2226_v42, %v1107_v5  ;;  %v1300_v18 = vmax.f32 %v1236_v3, 0.0  ;;  %v1240_v19 = vadd.f32 %v2231_v43, %v1172_v4 }
 0x1ae   : > { %1353 = vst [vmem:[#allocation7 + $0xc0] sm:$0xff] %v1289_v36  ;;  %v1176_v20 = vmul.f32 %v2226_v42, %v1108_v9  ;;  %v1301_v22 = vmax.f32 %v1237_v7, 0.0  ;;  %v1241_v23 = vadd.f32 %v2231_v43, %v1173_v8  ;;  %v1177_v24 = vmul.f32 %v2226_v42, %v1109_v13 }
 0x1af   : > { %1354 = vst [vmem:[#allocation7 + $0xc8] sm:$0xff] %v1290_v40  ;;  %v1302_v26 = vmax.f32 %v1238_v11, 0.0  ;;  %v1242_v27 = vadd.f32 %v2231_v43, %v1174_v12  ;;  %v1178_v28 = vmul.f32 %v2226_v42, %v1110_v17  ;;  %v1303_v30 = vmax.f32 %v1239_v15, 0.0 }
 0x1b0   : > { %1355 = vst [vmem:[#allocation7 + $0xd0] sm:$0xff] %v1291_v46  ;;  %v1243_v31 = vadd.f32 %v2231_v43, %v1175_v16  ;;  %v1179_v32 = vmul.f32 %v2226_v42, %v1111_v21  ;;  %v1304_v34 = vmax.f32 %v1240_v19, 0.0  ;;  %v1244_v35 = vadd.f32 %v2231_v43, %v1176_v20 }
 0x1b1   : > { %1356 = vst [vmem:[#allocation7 + $0xd8] sm:$0xff] %v1292_v50  ;;  %v1180_v36 = vmul.f32 %v2226_v42, %v1112_v25  ;;  %v1305_v38 = vmax.f32 %v1241_v23, 0.0  ;;  %v1245_v39 = vadd.f32 %v2231_v43, %v1177_v24  ;;  %v1181_v40 = vmul.f32 %v2226_v42, %v1113_v29 }
 0x1b2   : > { %1357 = vst [vmem:[#allocation7 + $0xe0] sm:$0xff] %v1293_v54  ;;  %v1306_v45 = vmax.f32 %v1242_v27, 0.0  ;;  %v1246_v46 = vadd.f32 %v2231_v43, %v1178_v28  ;;  %v1182_v47 = vmul.f32 %v2226_v42, %v1114_v33  ;;  %v1307_v49 = vmax.f32 %v1243_v31, 0.0 }
 0x1b3   : > { %1358 = vst [vmem:[#allocation7 + $0xe8] sm:$0xff] %v1294_v58  ;;  %v1247_v50 = vadd.f32 %v2231_v43, %v1179_v32  ;;  %v1183_v51 = vmul.f32 %v2226_v42, %v1115_v37  ;;  %v1308_v53 = vmax.f32 %v1244_v35, 0.0  ;;  %v1248_v54 = vadd.f32 %v2231_v43, %v1180_v36 }
 0x1b4   : > { %1359 = vst [vmem:[#allocation7 + $0xf0] sm:$0xff] %v1295_v62  ;;  %v1184_v55 = vmul.f32 %v2226_v42, %v1116_v41  ;;  %v1196_v57 = vmul.f32 %v2226_v42, %v1128_v44  ;;  %v1309_v58 = vmax.f32 %v1245_v39, 0.0  ;;  %v1249_v59 = vadd.f32 %v2231_v43, %v1181_v40 }
 0x1b5   : > { %1360 = vst [vmem:[#allocation7 + $0xf8] sm:$0xff] %v1296_v2  ;;  %v1185_v60 = vmul.f32 %v2226_v42, %v1117_v48  ;;  %v1310_v62 = vmax.f32 %v1246_v46, 0.0  ;;  %v1250_v63 = vadd.f32 %v2231_v43, %v1182_v47  ;;  %v1186_v0 = vmul.f32 %v2226_v42, %v1118_v52 }
 0x1b6   : > { %1361 = vst [vmem:[#allocation7 + $0x100] sm:$0xff] %v1297_v6  ;;  %v2339_v2 = vadd.f32 %v2231_v43, %v1196_v57  ;;  %v1311_v3 = vmax.f32 %v1247_v50, 0.0  ;;  %v1251_v4 = vadd.f32 %v2231_v43, %v1183_v51  ;;  %v1187_v5 = vmul.f32 %v2226_v42, %v1119_v56  ;;  %v1122_v6 = vld [vmem:[#allocation7 + $0x1c8] sm:$0xff] }
 0x1b7   : > { %1362 = vst [vmem:[#allocation7 + $0x108] sm:$0xff] %v1298_v10  ;;  %v1312_v7 = vmax.f32 %v1248_v54, 0.0  ;;  %v1252_v8 = vadd.f32 %v2231_v43, %v1184_v55  ;;  %v1188_v9 = vmul.f32 %v2226_v42, %v1120_v61  ;;  %v1123_v10 = vld [vmem:[#allocation7 + $0x1d0] sm:$0xff]  ;;  %v1313_v11 = vmax.f32 %v1249_v59, 0.0 }
 0x1b8   : > { %1363 = vst [vmem:[#allocation7 + $0x110] sm:$0xff] %v1299_v14  ;;  %v1253_v12 = vadd.f32 %v2231_v43, %v1185_v60  ;;  %v1189_v13 = vmul.f32 %v2226_v42, %v1121_v1  ;;  %v1124_v14 = vld [vmem:[#allocation7 + $0x1d8] sm:$0xff]  ;;  %v1314_v15 = vmax.f32 %v1250_v63, 0.0  ;;  %v1254_v16 = vadd.f32 %v2231_v43, %v1186_v0 }
 0x1b9   : > { %1364 = vst [vmem:[#allocation7 + $0x118] sm:$0xff] %v1300_v18  ;;  %v1190_v17 = vmul.f32 %v2226_v42, %v1122_v6  ;;  %v1125_v18 = vld [vmem:[#allocation7 + $0x1e0] sm:$0xff]  ;;  %v1315_v19 = vmax.f32 %v1251_v4, 0.0  ;;  %v1255_v20 = vadd.f32 %v2231_v43, %v1187_v5  ;;  %v1191_v21 = vmul.f32 %v2226_v42, %v1123_v10 }
 0x1ba   : > { %1365 = vst [vmem:[#allocation7 + $0x120] sm:$0xff] %v1301_v22  ;;  %v1126_v22 = vld [vmem:[#allocation7 + $0x1e8] sm:$0xff]  ;;  %v1316_v23 = vmax.f32 %v1252_v8, 0.0  ;;  %v1256_v24 = vadd.f32 %v2231_v43, %v1188_v9  ;;  %v1192_v25 = vmul.f32 %v2226_v42, %v1124_v14  ;;  %v1317_v27 = vmax.f32 %v1253_v12, 0.0 }
 0x1bb   : > { %1366 = vst [vmem:[#allocation7 + $0x128] sm:$0xff] %v1302_v26  ;;  %v1127_v26 = vld [vmem:[#allocation7 + $0x1f0] sm:$0xff]  ;;  %v1257_v28 = vadd.f32 %v2231_v43, %v1189_v13  ;;  %v1193_v29 = vmul.f32 %v2226_v42, %v1125_v18  ;;  %v1258_v31 = vadd.f32 %v2231_v43, %v1190_v17  ;;  %v1194_v32 = vmul.f32 %v2226_v42, %v1126_v22 }
 0x1bc   : > { %1367 = vst [vmem:[#allocation7 + $0x130] sm:$0xff] %v1303_v30  ;;  %v1318_v30 = vmax.f32 %v1254_v16, 0.0  ;;  %v1319_v33 = vmax.f32 %v1255_v20, 0.0  ;;  %v1195_v35 = vmul.f32 %v2226_v42, %v1127_v26  ;;  %v1320_v36 = vmax.f32 %v1256_v24, 0.0 }
 0x1bd   : > { %1368 = vst [vmem:[#allocation7 + $0x138] sm:$0xff] %v1304_v34  ;;  %v1259_v34 = vadd.f32 %v2231_v43, %v1191_v21  ;;  %v1260_v37 = vadd.f32 %v2231_v43, %v1192_v25  ;;  %v1261_v39 = vadd.f32 %v2231_v43, %v1193_v29  ;;  %v1322_v40 = vmax.f32 %v1258_v31, 0.0 }
 0x1be   : > { %1369 = vst [vmem:[#allocation7 + $0x140] sm:$0xff] %v1305_v38  ;;  %v1321_v38 = vmax.f32 %v1257_v28, 0.0  ;;  %v1262_v41 = vadd.f32 %v2231_v43, %v1194_v32 }
 0x1bf   : > { %1370 = vst [vmem:[#allocation7 + $0x148] sm:$0xff] %v1306_v45  ;;  %v1323_v44 = vmax.f32 %v1259_v34, 0.0  ;;  %v1263_v45 = vadd.f32 %v2231_v43, %v1195_v35  ;;  %v1324_v46 = vmax.f32 %v1260_v37, 0.0  ;;  %v1325_v42 = vmax.f32 %v1261_v39, 0.0 }
 0x1c0   : > { %1371 = vst [vmem:[#allocation7 + $0x150] sm:$0xff] %v1307_v49  ;;  %v1326_v47 = vmax.f32 %v1262_v41, 0.0  ;;  %v1328_v49 = vmax.f32 %v2339_v2, 0.0 }
 0x1c1   : > { %1372 = vst [vmem:[#allocation7 + $0x158] sm:$0xff] %v1308_v53  ;;  %v1327_v48 = vmax.f32 %v1263_v45, 0.0 }
 0x1c2   : > { %1373 = vst [vmem:[#allocation7 + $0x160] sm:$0xff] %v1309_v58 }
 0x1c3   : > { %1374 = vst [vmem:[#allocation7 + $0x168] sm:$0xff] %v1310_v62 }
 0x1c4   : > { %1375 = vst [vmem:[#allocation7 + $0x170] sm:$0xff] %v1311_v3 }
 0x1c5   : > { %1376 = vst [vmem:[#allocation7 + $0x178] sm:$0xff] %v1312_v7 }
 0x1c6   : > { %1377 = vst [vmem:[#allocation7 + $0x180] sm:$0xff] %v1313_v11 }
 0x1c7   : > { %1378 = vst [vmem:[#allocation7 + $0x188] sm:$0xff] %v1314_v15 }
 0x1c8   : > { %1379 = vst [vmem:[#allocation7 + $0x190] sm:$0xff] %v1315_v19 }
 0x1c9   : > { %1380 = vst [vmem:[#allocation7 + $0x198] sm:$0xff] %v1316_v23 }
 0x1ca   : > { %1381 = vst [vmem:[#allocation7 + $0x1a0] sm:$0xff] %v1317_v27 }
 0x1cb   : > { %1382 = vst [vmem:[#allocation7 + $0x1a8] sm:$0xff] %v1318_v30 }
 0x1cc   : > { %1383 = vst [vmem:[#allocation7 + $0x1b0] sm:$0xff] %v1319_v33 }
 0x1cd   : > { %1384 = vst [vmem:[#allocation7 + $0x1b8] sm:$0xff] %v1320_v36 }
 0x1ce   : > { %1385 = vst [vmem:[#allocation7 + $0x1c0] sm:$0xff] %v1321_v38 }
 0x1cf   : > { %1386 = vst [vmem:[#allocation7 + $0x1c8] sm:$0xff] %v1322_v40 }
 0x1d0   : > { %1387 = vst [vmem:[#allocation7 + $0x1d0] sm:$0xff] %v1323_v44 }
 0x1d1   : > { %1388 = vst [vmem:[#allocation7 + $0x1d8] sm:$0xff] %v1324_v46 }
 0x1d2   : > { %1389 = vst [vmem:[#allocation7 + $0x1e0] sm:$0xff] %v1325_v42 }
 0x1d3   : > { %1390 = vst [vmem:[#allocation7 + $0x1e8] sm:$0xff] %v1326_v47 }
 0x1d4   : > { %1391 = vst [vmem:[#allocation7 + $0x1f0] sm:$0xff] %v1327_v48 }
 0x1d5   : > { %1392 = vst [vmem:[#allocation7 + $0x1f8] sm:$0xff] %v1328_v49 }
 0x1d6 PF: > { %p1785_p1 = scmp.eq.s32.totalorder %s1525_s21, 1  ;;  %s1404_s24 = sshll.u32 %s2391_s4, 4  ;;  %s1405_s24 = int_to_ptr.hbm [resolvable:$true] %s1404_s24 }
 0x1d7   : > { %s1996_s30 = smov [#allocation7]   ;;  %s1997_s6 = smov 128  }
 0x1d8   : > { %s1402_s5 = sshll.u32 %s1996_s30, 4  ;;  %s1998_s7 = smov 8   ;;  %s1403_s5 = int_to_ptr.vmem [resolvable:$true] %s1402_s5 }
 0x1d9   : > { %1774 = dma.vmem_to_hbm [thread:$0]  (%p1785_p1), %s1403_s5, 8192, %s1405_s24, [#allocation4], %s1997_s6, %s1997_s6, %s1998_s7  }
 0x1da   : > { %1965 = dma.done.wait (%p1785_p1), [#allocation4], 8192  }
 0x1db   : > { %1967 = vsyncadd (%p1785_p1), [#allocation4], 4294959104 }
 0x1dc PF: > { %s21_s20 = sadd.s32 1, %s1990_s20   ;;  %s2395_s15 = smov %s1974_s16 }
 0x1dd   : > { %p18_p2 = scmp.ge.s32.totalorder %s21_s20, 4   ;;  %s2396_s16 = smov %s1978_s17 }
 0x1de   : > { %s2397_s17 = smov %s2075_s27  ;;  %s2398_s18 = smov %s1986_s19 }
 0x1df   : > { %s2399_s19 = smov %s2401_s22  ;;  %20 = sbr.rel (!%p18_p2) target bundleno = 7 (0x7), region = 101 }
 0x1e4   :  { %1421 = vsyncpa [#allocation3], 1 }
 0x1e5   :  { %1423 = vsyncpa [#allocation3 + $0x1], 1 }
 0x1e6   :  { %1424 = vsyncpa [#allocation6], 1 }
 0x1e7   :  { %1426 = vsyncpa [#allocation6 + $0x1], 1 }
 0x1e8   :  { %1427 = vsyncpa [#allocation4], 1 }
 0x1e9   :  { %1429 = vsyncpa [#allocation4 + $0x1], 1 }

</bundles_post_ra>
